<compile_context>
chip_gen: v5e
topology: v5e:2x2
jax: 0.10.0
libtpu: 0.0.40
codegen_flags: <defaults>
</compile_context>

<pallas_src>
import functools

import jax
import jax.numpy as jnp
from jax.experimental import pallas as pl
from jax.experimental.pallas import tpu as pltpu


# ----------------------------------------------------------------------------
# Pallas kernel: hoisted input projection + unrolled GRU recurrence + fused
# output projection.
# ----------------------------------------------------------------------------
def _rnn_net_kernel(x_ref, xar_ref, wih_ref, whh_ref, bgi_ref, bhn_ref,
                    wout_ref, bout_ref, out_ref, *, hid_pad, seq_len,
                    batch_pad):
    Hp, Bp, S = hid_pad, batch_pad, seq_len

    # --- Hoisted input projection: all timesteps in one MXU call. ----------
    # x_ref is time-major flattened: row t*Bp + b == x[b, t, :] (b < B).
    gi_all = jnp.dot(x_ref[...], wih_ref[...],
                     preferred_element_type=jnp.float32) + bgi_ref[...]  # (S*Bp, 3Hp)

    w_hh = whh_ref[...]                                    # (Hp, 3Hp), loaded once
    bhn = jnp.broadcast_to(bhn_ref[...], (Bp, Hp))         # hoisted broadcast

    # --- Serial recurrence (fully unrolled, static sublane-aligned slices). -
    h = jnp.zeros((Bp, Hp), jnp.float32)                   # h0 = 0 (lives in vregs)
    for t in range(S):
        gi = gi_all[t * Bp:(t + 1) * Bp, :]                # (Bp, 3Hp) aligned slice
        gh = jnp.dot(h, w_hh, preferred_element_type=jnp.float32)  # (Bp, 3Hp)

        r = jax.nn.sigmoid(gi[:, 0 * Hp:1 * Hp] + gh[:, 0 * Hp:1 * Hp])
        z = jax.nn.sigmoid(gi[:, 1 * Hp:2 * Hp] + gh[:, 1 * Hp:2 * Hp])
        n = jnp.tanh(gi[:, 2 * Hp:3 * Hp] + r * (gh[:, 2 * Hp:3 * Hp] + bhn))

        h = (1.0 - z) * n + z * h

    # --- Fused epilogue: [h | x_ar] @ [W_lin ; W_ar] + (b_lin + b_ar). ------
    cat = jnp.concatenate([h, xar_ref[...]], axis=-1)      # (Bp, Hp + Sp)
    out = jnp.dot(cat, wout_ref[...],
                  preferred_element_type=jnp.float32) + bout_ref[...]
    out_ref[...] = out.astype(out_ref.dtype)                # lane-dense store


# ----------------------------------------------------------------------------
# Wrapper: packs / pads parameters and calls the kernel once.
# ----------------------------------------------------------------------------
def rnn_net_forward(x, params):
    """x: (batch, seq_len, input_dim) f32 -> (batch, output_dim) f32."""
    B, S, D = x.shape
    H = params["w_hh"].shape[0]
    O = params["w_lin"].shape[1]

    Hp = ((H + 127) // 128) * 128        # gate / hidden lane padding
    Sp = ((S + 127) // 128) * 128        # x_ar lane padding
    Op = ((O + 127) // 128) * 128        # output lane padding (unmasked vst)
    Bp = ((B + 7) // 8) * 8              # batch sublane padding

    def pad_gate_cols(w, rows):
        # (rows, 3H) -> (rows, 3*Hp) with each gate block zero-padded to Hp lanes.
        out = jnp.zeros((rows, 3 * Hp), jnp.float32)
        for g in range(3):
            out = out.at[:, g * Hp:g * Hp + H].set(w[:, g * H:(g + 1) * H])
        return out

    # Input-side gate weights (D, 3*Hp); hidden-side (Hp, 3*Hp) with zero rows >= H.
    w_ih_p = pad_gate_cols(params["w_ih"], D)
    w_hh_p = jnp.zeros((Hp, 3 * Hp), jnp.float32)
    for g in range(3):
        w_hh_p = w_hh_p.at[:H, g * Hp:g * Hp + H].set(
            params["w_hh"][:, g * H:(g + 1) * H])

    # Fold b_hr, b_hz into the (precomputed) input-projection bias; keep b_hn.
    b_gi = params["b_ih"].at[:, :2 * H].add(params["b_hh"][:, :2 * H])
    b_gi_p = pad_gate_cols(b_gi, 1)                                  # (1, 3*Hp)
    b_hn_p = jnp.zeros((1, Hp), jnp.float32).at[:, :H].set(
        params["b_hh"][:, 2 * H:3 * H])                              # (1, Hp)

    # Fused epilogue weight: [W_lin (Hp rows) ; W_ar (Sp rows)] -> (Hp+Sp, Op).
    w_lin_p = jnp.zeros((Hp, Op), jnp.float32).at[:H, :O].set(params["w_lin"])
    w_ar_p = jnp.zeros((Sp, Op), jnp.float32).at[:S, :O].set(params["w_ar"])
    w_out = jnp.concatenate([w_lin_p, w_ar_p], axis=0)
    b_out = jnp.zeros((1, Op), jnp.float32).at[:, :O].set(
        params["b_lin"] + params["b_ar"])                            # (1, Op)

    # Time-major, sublane-padded input and lane-padded autoregressive input.
    x_tm = jnp.zeros((S, Bp, D), jnp.float32).at[:, :B, :].set(
        jnp.transpose(x, (1, 0, 2)))
    x_flat = x_tm.reshape(S * Bp, D)                                 # (S*Bp, D)
    x_ar_p = jnp.zeros((Bp, Sp), jnp.float32).at[:B, :S].set(x[:, :, 0])

    args = (x_flat, x_ar_p, w_ih_p, w_hh_p, b_gi_p, b_hn_p, w_out, b_out)

    kernel = functools.partial(_rnn_net_kernel, hid_pad=Hp, seq_len=S,
                               batch_pad=Bp)

    # Single invocation (no grid): everything is resident in VMEM, no pipeline
    # overhead, no double buffering.
    out_padded = pl.pallas_call(
        kernel,
        out_shape=jax.ShapeDtypeStruct((Bp, Op), jnp.float32),
        in_specs=[pl.BlockSpec(memory_space=pltpu.MemorySpace.VMEM)] * len(args),
        out_specs=pl.BlockSpec(memory_space=pltpu.MemorySpace.VMEM),
    )(*args)
    return out_padded[:B, :O]


# ----------------------------------------------------------------------------
# Deterministic parameter init (PyTorch-style uniform(-k, k)); weights stored
# transposed relative to PyTorch so math is activation @ weight.
# ----------------------------------------------------------------------------
def init_params(key, input_dim, hid_dim, output_dim, seq_len):
    ks = jax.random.split(key, 10)
    k_gru = 1.0 / jnp.sqrt(hid_dim)
    k_lin = 1.0 / jnp.sqrt(hid_dim)
    k_ar = 1.0 / jnp.sqrt(seq_len)
    u = lambda k, shape, lim: jax.random.uniform(
        k, shape, jnp.float32, minval=-lim, maxval=lim)
    return {
        # GRU: (in, 3H) / (H, 3H), gate order [r | z | n]
        "w_ih": u(ks[0], (input_dim, 3 * hid_dim), k_gru),
        "w_hh": u(ks[1], (hid_dim, 3 * hid_dim), k_gru),
        "b_ih": u(ks[2], (1, 3 * hid_dim), k_gru),
        "b_hh": u(ks[3], (1, 3 * hid_dim), k_gru),
        # lin: hid -> out
        "w_lin": u(ks[4], (hid_dim, output_dim), k_lin),
        "b_lin": u(ks[5], (1, output_dim), k_lin),
        # ar: seq_len -> out
        "w_ar": u(ks[6], (seq_len, output_dim), k_ar),
        "b_ar": u(ks[7], (1, output_dim), k_ar),
    }


# ----------------------------------------------------------------------------
# Pure-JAX reference (mirrors torch.nn.GRU / nn.Linear semantics exactly)
# ----------------------------------------------------------------------------
def rnn_net_reference(x, params):
    B, S, D = x.shape
    H = params["w_hh"].shape[0]
    h = jnp.zeros((B, H), jnp.float32)
    for t in range(S):
        x_t = x[:, t, :]
        gi = x_t @ params["w_ih"] + params["b_ih"]
        gh = h @ params["w_hh"] + params["b_hh"]
        r = jax.nn.sigmoid(gi[:, :H] + gh[:, :H])
        z = jax.nn.sigmoid(gi[:, H:2 * H] + gh[:, H:2 * H])
        n = jnp.tanh(gi[:, 2 * H:] + r * gh[:, 2 * H:])
        h = (1.0 - z) * n + z * h
    out = h @ params["w_lin"] + params["b_lin"]
    ar = x[:, :, 0] @ params["w_ar"] + params["b_ar"]
    return out + ar


if __name__ == "__main__":
    batch, seq_len, input_dim, hid_dim, output_dim = 2, 8, 16, 32, 8

    key = jax.random.PRNGKey(0)
    k_x, k_p = jax.random.split(key)
    x = jax.random.normal(k_x, (batch, seq_len, input_dim), jnp.float32)
    params = init_params(k_p, input_dim, hid_dim, output_dim, seq_len)

    out = rnn_net_forward(x, params)
    out = jax.block_until_ready(out)

    ref = rnn_net_reference(x, params)
    assert out.shape == (batch, output_dim)
    assert jnp.allclose(out, ref, atol=1e-5, rtol=1e-5), "mismatch vs reference"

    print("KERNEL_OK")
</pallas_src>

<mosaic_0001>
module attributes {stable_mosaic.version = 11 : i64} {
  func.func @_rnn_net_kernel(%arg0: memref<64x16xf32, #tpu.memory_space<vmem>>, %arg1: memref<8x128xf32, #tpu.memory_space<vmem>>, %arg2: memref<16x384xf32, #tpu.memory_space<vmem>>, %arg3: memref<128x384xf32, #tpu.memory_space<vmem>>, %arg4: memref<1x384xf32, #tpu.memory_space<vmem>>, %arg5: memref<1x128xf32, #tpu.memory_space<vmem>>, %arg6: memref<256x128xf32, #tpu.memory_space<vmem>>, %arg7: memref<1x128xf32, #tpu.memory_space<vmem>>, %arg8: memref<8x128xf32, #tpu.memory_space<vmem>>) attributes {dimension_semantics = [], scalar_prefetch = 0 : i64, scratch_operands = 0 : i64, tpu.core_type = #tpu.core_type<tc>} {
    %c0 = arith.constant 0 : index
    %c0_0 = arith.constant 0 : index
    %0 = vector.load %arg0[%c0, %c0_0] : memref<64x16xf32, #tpu.memory_space<vmem>>, vector<64x16xf32>
    %c0_1 = arith.constant 0 : index
    %c0_2 = arith.constant 0 : index
    %1 = vector.load %arg2[%c0_1, %c0_2] : memref<16x384xf32, #tpu.memory_space<vmem>>, vector<16x384xf32>
    %cst = arith.constant dense<0.000000e+00> : vector<64x384xf32>
    %2 = tpu.matmul %0, %1, %cst {dimension_numbers = #tpu.dot_dimension_numbers<[1], [0], [0], [1], [0, 0, 1, 1], [], []>} : vector<64x16xf32>, vector<16x384xf32>, vector<64x384xf32> -> vector<64x384xf32>
    %c0_3 = arith.constant 0 : index
    %c0_4 = arith.constant 0 : index
    %3 = vector.load %arg4[%c0_3, %c0_4] : memref<1x384xf32, #tpu.memory_space<vmem>>, vector<1x384xf32>
    %4 = vector.broadcast %3 : vector<1x384xf32> to vector<64x384xf32>
    %5 = arith.addf %2, %4 : vector<64x384xf32>
    %c0_5 = arith.constant 0 : index
    %c0_6 = arith.constant 0 : index
    %6 = vector.load %arg3[%c0_5, %c0_6] : memref<128x384xf32, #tpu.memory_space<vmem>>, vector<128x384xf32>
    %c0_7 = arith.constant 0 : index
    %c0_8 = arith.constant 0 : index
    %7 = vector.load %arg5[%c0_7, %c0_8] : memref<1x128xf32, #tpu.memory_space<vmem>>, vector<1x128xf32>
    %8 = vector.shape_cast %7 : vector<1x128xf32> to vector<1x128xf32>
    %9 = vector.broadcast %8 : vector<1x128xf32> to vector<8x128xf32>
    %cst_9 = arith.constant 0.000000e+00 : f32
    %10 = vector.broadcast %cst_9 : f32 to vector<8x128xf32>
    %11 = vector.extract_strided_slice %5 {offsets = [0, 0], sizes = [8, 384], strides = [1, 1]} : vector<64x384xf32> to vector<8x384xf32>
    %cst_10 = arith.constant dense<0.000000e+00> : vector<8x384xf32>
    %12 = tpu.matmul %10, %6, %cst_10 {dimension_numbers = #tpu.dot_dimension_numbers<[1], [0], [0], [1], [0, 0, 1, 1], [], []>} : vector<8x128xf32>, vector<128x384xf32>, vector<8x384xf32> -> vector<8x384xf32>
    %13 = vector.extract_strided_slice %11 {offsets = [0, 0], sizes = [8, 128], strides = [1, 1]} : vector<8x384xf32> to vector<8x128xf32>
    %14 = vector.extract_strided_slice %12 {offsets = [0, 0], sizes = [8, 128], strides = [1, 1]} : vector<8x384xf32> to vector<8x128xf32>
    %15 = arith.addf %13, %14 : vector<8x128xf32>
    %16 = arith.negf %15 : vector<8x128xf32>
    %17 = math.exp %16 : vector<8x128xf32>
    %cst_11 = arith.constant 1.000000e+00 : f32
    %18 = vector.broadcast %cst_11 : f32 to vector<8x128xf32>
    %19 = arith.addf %18, %17 : vector<8x128xf32>
    %20 = arith.divf %18, %19 : vector<8x128xf32>
    %21 = vector.extract_strided_slice %11 {offsets = [0, 128], sizes = [8, 128], strides = [1, 1]} : vector<8x384xf32> to vector<8x128xf32>
    %22 = vector.extract_strided_slice %12 {offsets = [0, 128], sizes = [8, 128], strides = [1, 1]} : vector<8x384xf32> to vector<8x128xf32>
    %23 = arith.addf %21, %22 : vector<8x128xf32>
    %24 = arith.negf %23 : vector<8x128xf32>
    %25 = math.exp %24 : vector<8x128xf32>
    %cst_12 = arith.constant 1.000000e+00 : f32
    %26 = vector.broadcast %cst_12 : f32 to vector<8x128xf32>
    %27 = arith.addf %26, %25 : vector<8x128xf32>
    %28 = arith.divf %26, %27 : vector<8x128xf32>
    %29 = vector.extract_strided_slice %11 {offsets = [0, 256], sizes = [8, 128], strides = [1, 1]} : vector<8x384xf32> to vector<8x128xf32>
    %30 = vector.extract_strided_slice %12 {offsets = [0, 256], sizes = [8, 128], strides = [1, 1]} : vector<8x384xf32> to vector<8x128xf32>
    %31 = arith.addf %30, %9 : vector<8x128xf32>
    %32 = arith.mulf %20, %31 : vector<8x128xf32>
    %33 = arith.addf %29, %32 : vector<8x128xf32>
    %34 = math.tanh %33 : vector<8x128xf32>
    %cst_13 = arith.constant 1.000000e+00 : f32
    %35 = vector.broadcast %cst_13 : f32 to vector<8x128xf32>
    %36 = arith.subf %35, %28 : vector<8x128xf32>
    %37 = arith.mulf %36, %34 : vector<8x128xf32>
    %38 = arith.mulf %28, %10 : vector<8x128xf32>
    %39 = arith.addf %37, %38 : vector<8x128xf32>
    %40 = vector.extract_strided_slice %5 {offsets = [8, 0], sizes = [8, 384], strides = [1, 1]} : vector<64x384xf32> to vector<8x384xf32>
    %cst_14 = arith.constant dense<0.000000e+00> : vector<8x384xf32>
    %41 = tpu.matmul %39, %6, %cst_14 {dimension_numbers = #tpu.dot_dimension_numbers<[1], [0], [0], [1], [0, 0, 1, 1], [], []>} : vector<8x128xf32>, vector<128x384xf32>, vector<8x384xf32> -> vector<8x384xf32>
    %42 = vector.extract_strided_slice %40 {offsets = [0, 0], sizes = [8, 128], strides = [1, 1]} : vector<8x384xf32> to vector<8x128xf32>
    %43 = vector.extract_strided_slice %41 {offsets = [0, 0], sizes = [8, 128], strides = [1, 1]} : vector<8x384xf32> to vector<8x128xf32>
    %44 = arith.addf %42, %43 : vector<8x128xf32>
    %45 = arith.negf %44 : vector<8x128xf32>
    %46 = math.exp %45 : vector<8x128xf32>
    %cst_15 = arith.constant 1.000000e+00 : f32
    %47 = vector.broadcast %cst_15 : f32 to vector<8x128xf32>
    %48 = arith.addf %47, %46 : vector<8x128xf32>
    %49 = arith.divf %47, %48 : vector<8x128xf32>
    %50 = vector.extract_strided_slice %40 {offsets = [0, 128], sizes = [8, 128], strides = [1, 1]} : vector<8x384xf32> to vector<8x128xf32>
    %51 = vector.extract_strided_slice %41 {offsets = [0, 128], sizes = [8, 128], strides = [1, 1]} : vector<8x384xf32> to vector<8x128xf32>
    %52 = arith.addf %50, %51 : vector<8x128xf32>
    %53 = arith.negf %52 : vector<8x128xf32>
    %54 = math.exp %53 : vector<8x128xf32>
    %cst_16 = arith.constant 1.000000e+00 : f32
    %55 = vector.broadcast %cst_16 : f32 to vector<8x128xf32>
    %56 = arith.addf %55, %54 : vector<8x128xf32>
    %57 = arith.divf %55, %56 : vector<8x128xf32>
    %58 = vector.extract_strided_slice %40 {offsets = [0, 256], sizes = [8, 128], strides = [1, 1]} : vector<8x384xf32> to vector<8x128xf32>
    %59 = vector.extract_strided_slice %41 {offsets = [0, 256], sizes = [8, 128], strides = [1, 1]} : vector<8x384xf32> to vector<8x128xf32>
    %60 = arith.addf %59, %9 : vector<8x128xf32>
    %61 = arith.mulf %49, %60 : vector<8x128xf32>
    %62 = arith.addf %58, %61 : vector<8x128xf32>
    %63 = math.tanh %62 : vector<8x128xf32>
    %cst_17 = arith.constant 1.000000e+00 : f32
    %64 = vector.broadcast %cst_17 : f32 to vector<8x128xf32>
    %65 = arith.subf %64, %57 : vector<8x128xf32>
    %66 = arith.mulf %65, %63 : vector<8x128xf32>
    %67 = arith.mulf %57, %39 : vector<8x128xf32>
    %68 = arith.addf %66, %67 : vector<8x128xf32>
    %69 = vector.extract_strided_slice %5 {offsets = [16, 0], sizes = [8, 384], strides = [1, 1]} : vector<64x384xf32> to vector<8x384xf32>
    %cst_18 = arith.constant dense<0.000000e+00> : vector<8x384xf32>
    %70 = tpu.matmul %68, %6, %cst_18 {dimension_numbers = #tpu.dot_dimension_numbers<[1], [0], [0], [1], [0, 0, 1, 1], [], []>} : vector<8x128xf32>, vector<128x384xf32>, vector<8x384xf32> -> vector<8x384xf32>
    %71 = vector.extract_strided_slice %69 {offsets = [0, 0], sizes = [8, 128], strides = [1, 1]} : vector<8x384xf32> to vector<8x128xf32>
    %72 = vector.extract_strided_slice %70 {offsets = [0, 0], sizes = [8, 128], strides = [1, 1]} : vector<8x384xf32> to vector<8x128xf32>
    %73 = arith.addf %71, %72 : vector<8x128xf32>
    %74 = arith.negf %73 : vector<8x128xf32>
    %75 = math.exp %74 : vector<8x128xf32>
    %cst_19 = arith.constant 1.000000e+00 : f32
    %76 = vector.broadcast %cst_19 : f32 to vector<8x128xf32>
    %77 = arith.addf %76, %75 : vector<8x128xf32>
    %78 = arith.divf %76, %77 : vector<8x128xf32>
    %79 = vector.extract_strided_slice %69 {offsets = [0, 128], sizes = [8, 128], strides = [1, 1]} : vector<8x384xf32> to vector<8x128xf32>
    %80 = vector.extract_strided_slice %70 {offsets = [0, 128], sizes = [8, 128], strides = [1, 1]} : vector<8x384xf32> to vector<8x128xf32>
    %81 = arith.addf %79, %80 : vector<8x128xf32>
    %82 = arith.negf %81 : vector<8x128xf32>
    %83 = math.exp %82 : vector<8x128xf32>
    %cst_20 = arith.constant 1.000000e+00 : f32
    %84 = vector.broadcast %cst_20 : f32 to vector<8x128xf32>
    %85 = arith.addf %84, %83 : vector<8x128xf32>
    %86 = arith.divf %84, %85 : vector<8x128xf32>
    %87 = vector.extract_strided_slice %69 {offsets = [0, 256], sizes = [8, 128], strides = [1, 1]} : vector<8x384xf32> to vector<8x128xf32>
    %88 = vector.extract_strided_slice %70 {offsets = [0, 256], sizes = [8, 128], strides = [1, 1]} : vector<8x384xf32> to vector<8x128xf32>
    %89 = arith.addf %88, %9 : vector<8x128xf32>
    %90 = arith.mulf %78, %89 : vector<8x128xf32>
    %91 = arith.addf %87, %90 : vector<8x128xf32>
    %92 = math.tanh %91 : vector<8x128xf32>
    %cst_21 = arith.constant 1.000000e+00 : f32
    %93 = vector.broadcast %cst_21 : f32 to vector<8x128xf32>
    %94 = arith.subf %93, %86 : vector<8x128xf32>
    %95 = arith.mulf %94, %92 : vector<8x128xf32>
    %96 = arith.mulf %86, %68 : vector<8x128xf32>
    %97 = arith.addf %95, %96 : vector<8x128xf32>
    %98 = vector.extract_strided_slice %5 {offsets = [24, 0], sizes = [8, 384], strides = [1, 1]} : vector<64x384xf32> to vector<8x384xf32>
    %cst_22 = arith.constant dense<0.000000e+00> : vector<8x384xf32>
    %99 = tpu.matmul %97, %6, %cst_22 {dimension_numbers = #tpu.dot_dimension_numbers<[1], [0], [0], [1], [0, 0, 1, 1], [], []>} : vector<8x128xf32>, vector<128x384xf32>, vector<8x384xf32> -> vector<8x384xf32>
    %100 = vector.extract_strided_slice %98 {offsets = [0, 0], sizes = [8, 128], strides = [1, 1]} : vector<8x384xf32> to vector<8x128xf32>
    %101 = vector.extract_strided_slice %99 {offsets = [0, 0], sizes = [8, 128], strides = [1, 1]} : vector<8x384xf32> to vector<8x128xf32>
    %102 = arith.addf %100, %101 : vector<8x128xf32>
    %103 = arith.negf %102 : vector<8x128xf32>
    %104 = math.exp %103 : vector<8x128xf32>
    %cst_23 = arith.constant 1.000000e+00 : f32
    %105 = vector.broadcast %cst_23 : f32 to vector<8x128xf32>
    %106 = arith.addf %105, %104 : vector<8x128xf32>
    %107 = arith.divf %105, %106 : vector<8x128xf32>
    %108 = vector.extract_strided_slice %98 {offsets = [0, 128], sizes = [8, 128], strides = [1, 1]} : vector<8x384xf32> to vector<8x128xf32>
    %109 = vector.extract_strided_slice %99 {offsets = [0, 128], sizes = [8, 128], strides = [1, 1]} : vector<8x384xf32> to vector<8x128xf32>
    %110 = arith.addf %108, %109 : vector<8x128xf32>
    %111 = arith.negf %110 : vector<8x128xf32>
    %112 = math.exp %111 : vector<8x128xf32>
    %cst_24 = arith.constant 1.000000e+00 : f32
    %113 = vector.broadcast %cst_24 : f32 to vector<8x128xf32>
    %114 = arith.addf %113, %112 : vector<8x128xf32>
    %115 = arith.divf %113, %114 : vector<8x128xf32>
    %116 = vector.extract_strided_slice %98 {offsets = [0, 256], sizes = [8, 128], strides = [1, 1]} : vector<8x384xf32> to vector<8x128xf32>
    %117 = vector.extract_strided_slice %99 {offsets = [0, 256], sizes = [8, 128], strides = [1, 1]} : vector<8x384xf32> to vector<8x128xf32>
    %118 = arith.addf %117, %9 : vector<8x128xf32>
    %119 = arith.mulf %107, %118 : vector<8x128xf32>
    %120 = arith.addf %116, %119 : vector<8x128xf32>
    %121 = math.tanh %120 : vector<8x128xf32>
    %cst_25 = arith.constant 1.000000e+00 : f32
    %122 = vector.broadcast %cst_25 : f32 to vector<8x128xf32>
    %123 = arith.subf %122, %115 : vector<8x128xf32>
    %124 = arith.mulf %123, %121 : vector<8x128xf32>
    %125 = arith.mulf %115, %97 : vector<8x128xf32>
    %126 = arith.addf %124, %125 : vector<8x128xf32>
    %127 = vector.extract_strided_slice %5 {offsets = [32, 0], sizes = [8, 384], strides = [1, 1]} : vector<64x384xf32> to vector<8x384xf32>
    %cst_26 = arith.constant dense<0.000000e+00> : vector<8x384xf32>
    %128 = tpu.matmul %126, %6, %cst_26 {dimension_numbers = #tpu.dot_dimension_numbers<[1], [0], [0], [1], [0, 0, 1, 1], [], []>} : vector<8x128xf32>, vector<128x384xf32>, vector<8x384xf32> -> vector<8x384xf32>
    %129 = vector.extract_strided_slice %127 {offsets = [0, 0], sizes = [8, 128], strides = [1, 1]} : vector<8x384xf32> to vector<8x128xf32>
    %130 = vector.extract_strided_slice %128 {offsets = [0, 0], sizes = [8, 128], strides = [1, 1]} : vector<8x384xf32> to vector<8x128xf32>
    %131 = arith.addf %129, %130 : vector<8x128xf32>
    %132 = arith.negf %131 : vector<8x128xf32>
    %133 = math.exp %132 : vector<8x128xf32>
    %cst_27 = arith.constant 1.000000e+00 : f32
    %134 = vector.broadcast %cst_27 : f32 to vector<8x128xf32>
    %135 = arith.addf %134, %133 : vector<8x128xf32>
    %136 = arith.divf %134, %135 : vector<8x128xf32>
    %137 = vector.extract_strided_slice %127 {offsets = [0, 128], sizes = [8, 128], strides = [1, 1]} : vector<8x384xf32> to vector<8x128xf32>
    %138 = vector.extract_strided_slice %128 {offsets = [0, 128], sizes = [8, 128], strides = [1, 1]} : vector<8x384xf32> to vector<8x128xf32>
    %139 = arith.addf %137, %138 : vector<8x128xf32>
    %140 = arith.negf %139 : vector<8x128xf32>
    %141 = math.exp %140 : vector<8x128xf32>
    %cst_28 = arith.constant 1.000000e+00 : f32
    %142 = vector.broadcast %cst_28 : f32 to vector<8x128xf32>
    %143 = arith.addf %142, %141 : vector<8x128xf32>
    %144 = arith.divf %142, %143 : vector<8x128xf32>
    %145 = vector.extract_strided_slice %127 {offsets = [0, 256], sizes = [8, 128], strides = [1, 1]} : vector<8x384xf32> to vector<8x128xf32>
    %146 = vector.extract_strided_slice %128 {offsets = [0, 256], sizes = [8, 128], strides = [1, 1]} : vector<8x384xf32> to vector<8x128xf32>
    %147 = arith.addf %146, %9 : vector<8x128xf32>
    %148 = arith.mulf %136, %147 : vector<8x128xf32>
    %149 = arith.addf %145, %148 : vector<8x128xf32>
    %150 = math.tanh %149 : vector<8x128xf32>
    %cst_29 = arith.constant 1.000000e+00 : f32
    %151 = vector.broadcast %cst_29 : f32 to vector<8x128xf32>
    %152 = arith.subf %151, %144 : vector<8x128xf32>
    %153 = arith.mulf %152, %150 : vector<8x128xf32>
    %154 = arith.mulf %144, %126 : vector<8x128xf32>
    %155 = arith.addf %153, %154 : vector<8x128xf32>
    %156 = vector.extract_strided_slice %5 {offsets = [40, 0], sizes = [8, 384], strides = [1, 1]} : vector<64x384xf32> to vector<8x384xf32>
    %cst_30 = arith.constant dense<0.000000e+00> : vector<8x384xf32>
    %157 = tpu.matmul %155, %6, %cst_30 {dimension_numbers = #tpu.dot_dimension_numbers<[1], [0], [0], [1], [0, 0, 1, 1], [], []>} : vector<8x128xf32>, vector<128x384xf32>, vector<8x384xf32> -> vector<8x384xf32>
    %158 = vector.extract_strided_slice %156 {offsets = [0, 0], sizes = [8, 128], strides = [1, 1]} : vector<8x384xf32> to vector<8x128xf32>
    %159 = vector.extract_strided_slice %157 {offsets = [0, 0], sizes = [8, 128], strides = [1, 1]} : vector<8x384xf32> to vector<8x128xf32>
    %160 = arith.addf %158, %159 : vector<8x128xf32>
    %161 = arith.negf %160 : vector<8x128xf32>
    %162 = math.exp %161 : vector<8x128xf32>
    %cst_31 = arith.constant 1.000000e+00 : f32
    %163 = vector.broadcast %cst_31 : f32 to vector<8x128xf32>
    %164 = arith.addf %163, %162 : vector<8x128xf32>
    %165 = arith.divf %163, %164 : vector<8x128xf32>
    %166 = vector.extract_strided_slice %156 {offsets = [0, 128], sizes = [8, 128], strides = [1, 1]} : vector<8x384xf32> to vector<8x128xf32>
    %167 = vector.extract_strided_slice %157 {offsets = [0, 128], sizes = [8, 128], strides = [1, 1]} : vector<8x384xf32> to vector<8x128xf32>
    %168 = arith.addf %166, %167 : vector<8x128xf32>
    %169 = arith.negf %168 : vector<8x128xf32>
    %170 = math.exp %169 : vector<8x128xf32>
    %cst_32 = arith.constant 1.000000e+00 : f32
    %171 = vector.broadcast %cst_32 : f32 to vector<8x128xf32>
    %172 = arith.addf %171, %170 : vector<8x128xf32>
    %173 = arith.divf %171, %172 : vector<8x128xf32>
    %174 = vector.extract_strided_slice %156 {offsets = [0, 256], sizes = [8, 128], strides = [1, 1]} : vector<8x384xf32> to vector<8x128xf32>
    %175 = vector.extract_strided_slice %157 {offsets = [0, 256], sizes = [8, 128], strides = [1, 1]} : vector<8x384xf32> to vector<8x128xf32>
    %176 = arith.addf %175, %9 : vector<8x128xf32>
    %177 = arith.mulf %165, %176 : vector<8x128xf32>
    %178 = arith.addf %174, %177 : vector<8x128xf32>
    %179 = math.tanh %178 : vector<8x128xf32>
    %cst_33 = arith.constant 1.000000e+00 : f32
    %180 = vector.broadcast %cst_33 : f32 to vector<8x128xf32>
    %181 = arith.subf %180, %173 : vector<8x128xf32>
    %182 = arith.mulf %181, %179 : vector<8x128xf32>
    %183 = arith.mulf %173, %155 : vector<8x128xf32>
    %184 = arith.addf %182, %183 : vector<8x128xf32>
    %185 = vector.extract_strided_slice %5 {offsets = [48, 0], sizes = [8, 384], strides = [1, 1]} : vector<64x384xf32> to vector<8x384xf32>
    %cst_34 = arith.constant dense<0.000000e+00> : vector<8x384xf32>
    %186 = tpu.matmul %184, %6, %cst_34 {dimension_numbers = #tpu.dot_dimension_numbers<[1], [0], [0], [1], [0, 0, 1, 1], [], []>} : vector<8x128xf32>, vector<128x384xf32>, vector<8x384xf32> -> vector<8x384xf32>
    %187 = vector.extract_strided_slice %185 {offsets = [0, 0], sizes = [8, 128], strides = [1, 1]} : vector<8x384xf32> to vector<8x128xf32>
    %188 = vector.extract_strided_slice %186 {offsets = [0, 0], sizes = [8, 128], strides = [1, 1]} : vector<8x384xf32> to vector<8x128xf32>
    %189 = arith.addf %187, %188 : vector<8x128xf32>
    %190 = arith.negf %189 : vector<8x128xf32>
    %191 = math.exp %190 : vector<8x128xf32>
    %cst_35 = arith.constant 1.000000e+00 : f32
    %192 = vector.broadcast %cst_35 : f32 to vector<8x128xf32>
    %193 = arith.addf %192, %191 : vector<8x128xf32>
    %194 = arith.divf %192, %193 : vector<8x128xf32>
    %195 = vector.extract_strided_slice %185 {offsets = [0, 128], sizes = [8, 128], strides = [1, 1]} : vector<8x384xf32> to vector<8x128xf32>
    %196 = vector.extract_strided_slice %186 {offsets = [0, 128], sizes = [8, 128], strides = [1, 1]} : vector<8x384xf32> to vector<8x128xf32>
    %197 = arith.addf %195, %196 : vector<8x128xf32>
    %198 = arith.negf %197 : vector<8x128xf32>
    %199 = math.exp %198 : vector<8x128xf32>
    %cst_36 = arith.constant 1.000000e+00 : f32
    %200 = vector.broadcast %cst_36 : f32 to vector<8x128xf32>
    %201 = arith.addf %200, %199 : vector<8x128xf32>
    %202 = arith.divf %200, %201 : vector<8x128xf32>
    %203 = vector.extract_strided_slice %185 {offsets = [0, 256], sizes = [8, 128], strides = [1, 1]} : vector<8x384xf32> to vector<8x128xf32>
    %204 = vector.extract_strided_slice %186 {offsets = [0, 256], sizes = [8, 128], strides = [1, 1]} : vector<8x384xf32> to vector<8x128xf32>
    %205 = arith.addf %204, %9 : vector<8x128xf32>
    %206 = arith.mulf %194, %205 : vector<8x128xf32>
    %207 = arith.addf %203, %206 : vector<8x128xf32>
    %208 = math.tanh %207 : vector<8x128xf32>
    %cst_37 = arith.constant 1.000000e+00 : f32
    %209 = vector.broadcast %cst_37 : f32 to vector<8x128xf32>
    %210 = arith.subf %209, %202 : vector<8x128xf32>
    %211 = arith.mulf %210, %208 : vector<8x128xf32>
    %212 = arith.mulf %202, %184 : vector<8x128xf32>
    %213 = arith.addf %211, %212 : vector<8x128xf32>
    %214 = vector.extract_strided_slice %5 {offsets = [56, 0], sizes = [8, 384], strides = [1, 1]} : vector<64x384xf32> to vector<8x384xf32>
    %cst_38 = arith.constant dense<0.000000e+00> : vector<8x384xf32>
    %215 = tpu.matmul %213, %6, %cst_38 {dimension_numbers = #tpu.dot_dimension_numbers<[1], [0], [0], [1], [0, 0, 1, 1], [], []>} : vector<8x128xf32>, vector<128x384xf32>, vector<8x384xf32> -> vector<8x384xf32>
    %216 = vector.extract_strided_slice %214 {offsets = [0, 0], sizes = [8, 128], strides = [1, 1]} : vector<8x384xf32> to vector<8x128xf32>
    %217 = vector.extract_strided_slice %215 {offsets = [0, 0], sizes = [8, 128], strides = [1, 1]} : vector<8x384xf32> to vector<8x128xf32>
    %218 = arith.addf %216, %217 : vector<8x128xf32>
    %219 = arith.negf %218 : vector<8x128xf32>
    %220 = math.exp %219 : vector<8x128xf32>
    %cst_39 = arith.constant 1.000000e+00 : f32
    %221 = vector.broadcast %cst_39 : f32 to vector<8x128xf32>
    %222 = arith.addf %221, %220 : vector<8x128xf32>
    %223 = arith.divf %221, %222 : vector<8x128xf32>
    %224 = vector.extract_strided_slice %214 {offsets = [0, 128], sizes = [8, 128], strides = [1, 1]} : vector<8x384xf32> to vector<8x128xf32>
    %225 = vector.extract_strided_slice %215 {offsets = [0, 128], sizes = [8, 128], strides = [1, 1]} : vector<8x384xf32> to vector<8x128xf32>
    %226 = arith.addf %224, %225 : vector<8x128xf32>
    %227 = arith.negf %226 : vector<8x128xf32>
    %228 = math.exp %227 : vector<8x128xf32>
    %cst_40 = arith.constant 1.000000e+00 : f32
    %229 = vector.broadcast %cst_40 : f32 to vector<8x128xf32>
    %230 = arith.addf %229, %228 : vector<8x128xf32>
    %231 = arith.divf %229, %230 : vector<8x128xf32>
    %232 = vector.extract_strided_slice %214 {offsets = [0, 256], sizes = [8, 128], strides = [1, 1]} : vector<8x384xf32> to vector<8x128xf32>
    %233 = vector.extract_strided_slice %215 {offsets = [0, 256], sizes = [8, 128], strides = [1, 1]} : vector<8x384xf32> to vector<8x128xf32>
    %234 = arith.addf %233, %9 : vector<8x128xf32>
    %235 = arith.mulf %223, %234 : vector<8x128xf32>
    %236 = arith.addf %232, %235 : vector<8x128xf32>
    %237 = math.tanh %236 : vector<8x128xf32>
    %cst_41 = arith.constant 1.000000e+00 : f32
    %238 = vector.broadcast %cst_41 : f32 to vector<8x128xf32>
    %239 = arith.subf %238, %231 : vector<8x128xf32>
    %240 = arith.mulf %239, %237 : vector<8x128xf32>
    %241 = arith.mulf %231, %213 : vector<8x128xf32>
    %242 = arith.addf %240, %241 : vector<8x128xf32>
    %c0_42 = arith.constant 0 : index
    %c0_43 = arith.constant 0 : index
    %243 = vector.load %arg1[%c0_42, %c0_43] : memref<8x128xf32, #tpu.memory_space<vmem>>, vector<8x128xf32>
    %244 = tpu.concatenate %242, %243 in 1 : vector<8x128xf32>, vector<8x128xf32> -> vector<8x256xf32>
    %c0_44 = arith.constant 0 : index
    %c0_45 = arith.constant 0 : index
    %245 = vector.load %arg6[%c0_44, %c0_45] : memref<256x128xf32, #tpu.memory_space<vmem>>, vector<256x128xf32>
    %cst_46 = arith.constant dense<0.000000e+00> : vector<8x128xf32>
    %246 = tpu.matmul %244, %245, %cst_46 {dimension_numbers = #tpu.dot_dimension_numbers<[1], [0], [0], [1], [0, 0, 1, 1], [], []>} : vector<8x256xf32>, vector<256x128xf32>, vector<8x128xf32> -> vector<8x128xf32>
    %c0_47 = arith.constant 0 : index
    %c0_48 = arith.constant 0 : index
    %247 = vector.load %arg7[%c0_47, %c0_48] : memref<1x128xf32, #tpu.memory_space<vmem>>, vector<1x128xf32>
    %248 = vector.broadcast %247 : vector<1x128xf32> to vector<8x128xf32>
    %249 = arith.addf %246, %248 : vector<8x128xf32>
    %c0_49 = arith.constant 0 : index
    %c0_50 = arith.constant 0 : index
    %250 = vector.load %arg8[%c0_49, %c0_50] : memref<8x128xf32, #tpu.memory_space<vmem>>, vector<8x128xf32>
    tpu.vector_store %arg8[%c0_49, %c0_50], %249 {strides = array<i32>} : memref<8x128xf32, #tpu.memory_space<vmem>>, vector<8x128xf32>,
    return
  }
}

</mosaic_0001>

<bundles_post_ra>
// kernel: tpu_custom_call.1
= control target key start
LH: loop header
LB: loop body
LE: loop exit
PB: predicated region body
PF: predicated region fallthrough
CT: control target
= control target key end

     0   :  { %13 = vsyncpa [#allocation3], 0  ;;  %s2340_s0 = inlined_call_operand.vmem [shape: f32[64,16], index: 0, kind: input, shape index: {}]   ;;  %s2341_s1 = inlined_call_operand.vmem [shape: f32[8,128], index: 1, kind: input, shape index: {}]   ;;  %s2342_s2 = inlined_call_operand.vmem [shape: f32[16,384], index: 2, kind: input, shape index: {}]   ;;  %s2343_s3 = inlined_call_operand.hbm [shape: f32[128,384], index: 3, kind: input, shape index: {}]   ;;  %s2344_s4 = inlined_call_operand.vmem [shape: f32[1,384], index: 4, kind: input, shape index: {}]   ;;  %s2345_s5 = inlined_call_operand.vmem [shape: f32[1,128], index: 5, kind: input, shape index: {}]   ;;  %s2346_s6 = inlined_call_operand.hbm [shape: f32[256,128], index: 6, kind: input, shape index: {}]   ;;  %s2347_s7 = inlined_call_operand.vmem [shape: f32[1,128], index: 7, kind: input, shape index: {}]   ;;  %s2348_s8 = inlined_call_operand.hbm [shape: f32[8,128], index: 8, kind: output, shape index: {}]  }
   0x1   :  { %14 = vsyncpa [#allocation6], 0 }
   0x2   :  { %15 = vsyncpa [#allocation4], 0  ;;  %s26_s29 = sshll.u32 %s2343_s3, 4  ;;  %s1501_s30 = smov [#allocation2]   ;;  %s27_s29 = int_to_ptr.hbm [resolvable:$true] %s26_s29 }
   0x3   :  { %s28_s9 = sshll.u32 %s1501_s30, 4  ;;  %s43_s12 = sshll.u32 %s2346_s6, 4  ;;  %s29_s9 = int_to_ptr.vmem [resolvable:$true] %s28_s9  ;;  %s44_s12 = int_to_ptr.hbm [resolvable:$true] %s43_s12 }
   0x4   :  { %s1502_s13 = smov 384   ;;  %s1503_s14 = smov 24  }
   0x5   :  { %34 = dma.hbm_to_vmem [thread:$0]  %s27_s29, 6144, %s29_s9, [#allocation3], %s1502_s13, %s1502_s13, %s1503_s14  }
   0x6   :  { %s1504_s15 = smov [#allocation5]   ;;  %s1505_s17 = smov 128  }
   0x7   :  { %s45_s16 = sshll.u32 %s1504_s15, 4  ;;  %s1506_s18 = smov 8   ;;  %s46_s16 = int_to_ptr.vmem [resolvable:$true] %s45_s16 }
   0x8   :  { %51 = dma.hbm_to_vmem [thread:$0]  %s44_s12, 4096, %s46_s16, [#allocation6], %s1505_s17, %s1505_s17, %s1506_s18  }
   0x9   :  { %1495 = dma.done.wait [#allocation3], 6144  }
   0xa   :  { %1496 = vsyncadd [#allocation3], 4294961152 }
   0xb   :  { %1497 = dma.done.wait [#allocation6], 4096  }
   0xc   :  { %1498 = vsyncadd [#allocation6], 4294963200  ;;  %v73_v0 = vld [vmem:[%s2342_s2 + $0x18] sm:$0xff]  ;;  %v1563_v1 = vld [vmem:[#allocation2 + $0x168] sm:$0xff]  ;;  %vm84_vm0 = vcmask 130048   ;;  %v1507_v39 = vmov 0.0  }
   0xd   :  { %v70_v2 = vld [vmem:[%s2342_s2] sm:$0xff]  ;;  %123 = vmatpush.msra.mxu0 %v73_v0  ;;  %284 = vmatpush.msra.mxu3 %v1563_v1  ;;  %v1569_v3 = vld [vmem:[#allocation2 + $0x150] sm:$0xff]  ;;  %v1576_v5 = vld [vmem:[#allocation2 + $0x138] sm:$0xff]  ;;  %s1508_s26 = smov [#allocation7]   ;;  %s1233_s30 = sshll.u32 %s2348_s8, 4  ;;  %s1234_s30 = int_to_ptr.hbm [resolvable:$true] %s1233_s30 }
   0xe   :  { %v1574_v4 = vld [vmem:[%s2340_s0] sm:$0xff]  ;;  %v1584_v7 = vld [vmem:[#allocation2 + $0x178] sm:$0xff]  ;;  %v1586_v8 = vld [vmem:[#allocation2 + $0x108] sm:$0xff]  ;;  %s1231_s27 = sshll.u32 %s1508_s26, 4  ;;  %s1232_s27 = int_to_ptr.vmem [resolvable:$true] %s1231_s27 }
   0xf   :  { %124 = vmatpush.msra.mxu0 %v70_v2  ;;  %285 = vmatpush.msra.mxu3 %v1569_v3  ;;  %v1581_v6 = vld [vmem:[#allocation2 + $0x120] sm:$0xff]  ;;  %v1592_v10 = vld [vmem:[#allocation2 + $0xf0] sm:$0xff]  ;;  %v1595_v11 = vld [vmem:[#allocation2 + $0x148] sm:$0xff] }
  0x10   :  { %1244 = vmatmul.msk.f32.vlgmr.msra.gmra.mxu0 %vm84_vm0, %v1574_v4  ;;  %v1590_v9 = vld [vmem:[#allocation2 + $0x160] sm:$0xff]  ;;  %v1601_v12 = vld [vmem:[%s2340_s0 + $0x8] sm:$0xff]  ;;  %v1603_v13 = vld [vmem:[#allocation2 + $0xd8] sm:$0xff] }
  0x11   :  { %286 = vmatpush.msra.mxu3 %v1576_v5  ;;  %324 = vmatpush.msrb.mxu0 %v1584_v7  ;;  %v1606_v14 = vld [vmem:[#allocation2 + $0x130] sm:$0xff]  ;;  %v1611_v15 = vld [vmem:[#allocation2 + $0xc0] sm:$0xff]  ;;  %v1613_v16 = vld [vmem:[#allocation2 + $0x118] sm:$0xff] }
  0x12   :  { %v1617_v17 = vld [vmem:[#allocation2 + $0xa8] sm:$0xff]  ;;  %v1619_v18 = vld [vmem:[#allocation2 + $0x100] sm:$0xff]  ;;  %v1623_v19 = vld [vmem:[#allocation2 + $0x90] sm:$0xff] }
  0x13   :  { %287 = vmatpush.msra.mxu3 %v1581_v6  ;;  %325 = vmatpush.msrb.mxu0 %v1590_v9  ;;  %v1629_v20 = vld [vmem:[%s2340_s0 + $0x10] sm:$0xff]  ;;  %v1632_v21 = vld [vmem:[#allocation2 + $0xe8] sm:$0xff]  ;;  %v1634_v22 = vld [vmem:[#allocation2 + $0x78] sm:$0xff] }
  0x14   :  { %v1638_v23 = vld [vmem:[#allocation2 + $0xd0] sm:$0xff]  ;;  %v1642_v24 = vld [vmem:[#allocation2 + $0x60] sm:$0xff]  ;;  %v1646_v25 = vld [vmem:[#allocation2 + $0xb8] sm:$0xff] }
  0x15   :  { %288 = vmatpush.msra.mxu3 %v1586_v8  ;;  %326 = vmatpush.msrb.mxu0 %v1595_v11  ;;  %v1648_v26 = vld [vmem:[#allocation2 + $0x48] sm:$0xff]  ;;  %v1652_v27 = vld [vmem:[#allocation2 + $0xa0] sm:$0xff]  ;;  %v1654_v28 = vld [vmem:[#allocation2 + $0x30] sm:$0xff] }
  0x16   :  { %2369 = vst [vmem:[#allocation11_spill] sm:$0xff] %v1654_v28  ;;  %v1660_v29 = vld [vmem:[%s2340_s0 + $0x18] sm:$0xff]  ;;  %v1663_v30 = vld [vmem:[#allocation2 + $0x88] sm:$0xff]  ;;  %v1669_v32 = vld [vmem:[#allocation2 + $0x70] sm:$0xff] }
  0x17   :  { %289 = vmatpush.msra.mxu3 %v1592_v10  ;;  %327 = vmatpush.msrb.mxu0 %v1606_v14  ;;  %v1665_v31 = vld [vmem:[#allocation2 + $0x18] sm:$0xff]  ;;  %v1673_v33 = vld [vmem:[#allocation2] sm:$0xff]  ;;  %v75_v34 = vld [vmem:[%s2342_s2 + $0x28] sm:$0xff] }
  0x18   :  { %1245 = vmatmul.msk.f32.gmra.mxu0 %vm84_vm0, %v1601_v12  ;;  %2370 = vst [vmem:[#allocation12_spill] sm:$0xff] %v1665_v31  ;;  %v1680_v35 = vld [vmem:[#allocation2 + $0x58] sm:$0xff]  ;;  %v1682_v36 = vld [vmem:[#allocation2 + $0x170] sm:$0xff]  ;;  %205 = vmatpush.msra.mxu2 %v75_v34  ;;  %v1689_v38 = vld [vmem:[#allocation2 + $0x40] sm:$0xff] }
  0x19   :  { %290 = vmatpush.msra.mxu3 %v1603_v13  ;;  %328 = vmatpush.msrb.mxu0 %v1613_v16  ;;  %2371 = vst [vmem:[#allocation13_spill] sm:$0xff] %v1673_v33  ;;  %v72_v37 = vld [vmem:[%s2342_s2 + $0x10] sm:$0xff]  ;;  %v1692_v40 = vld [vmem:[#allocation2 + $0x158] sm:$0xff]  ;;  %v74_v41 = vld [vmem:[%s2342_s2 + $0x20] sm:$0xff] }
  0x1a   :  { %2372 = vst [vmem:[#allocation14_spill] sm:$0xff] %v1689_v38  ;;  %206 = vmatpush.msra.mxu2 %v72_v37  ;;  %v1697_v42 = vld [vmem:[#allocation2 + $0x28] sm:$0xff]  ;;  %v1703_v43 = vld [vmem:[%s2340_s0 + $0x20] sm:$0xff]  ;;  %164 = vmatpush.msra.mxu1 %v74_v41  ;;  %v1715_v46 = vld [vmem:[#allocation2 + $0x10] sm:$0xff] }
  0x1b   :  { %291 = vmatpush.msra.mxu3 %v1611_v15  ;;  %329 = vmatpush.msrb.mxu0 %v1619_v18  ;;  %2373 = vst [vmem:[#allocation15_spill] sm:$0xff] %v1697_v42  ;;  %v71_v44 = vld [vmem:[%s2342_s2 + $0x8] sm:$0xff]  ;;  %v1709_v45 = vld [vmem:[#allocation2 + $0x140] sm:$0xff]  ;;  %v1724_v48 = vld [vmem:[#allocation2 + $0x110] sm:$0xff] }
  0x1c   :  { %1260 = vmatmul.msk.f32.vlgmr.msra.gmra.mxu2 %vm84_vm0, %v1574_v4  ;;  %2374 = vst [vmem:[#allocation16_spill] sm:$0xff] %v1715_v46  ;;  %v1719_v47 = vld [vmem:[#allocation2 + $0x128] sm:$0xff]  ;;  %165 = vmatpush.msra.mxu1 %v71_v44  ;;  %v1730_v49 = vld [vmem:[#allocation2 + $0xf8] sm:$0xff]  ;;  %v1741_v51 = vld [vmem:[#allocation2 + $0xe0] sm:$0xff] }
  0x1d   :  { %292 = vmatpush.msra.mxu3 %v1617_v17  ;;  %330 = vmatpush.msrb.mxu0 %v1632_v21  ;;  %v1738_v50 = vld [vmem:[%s2340_s0 + $0x28] sm:$0xff]  ;;  %v1756_v53 = vld [vmem:[#allocation2 + $0xb0] sm:$0xff]  ;;  %v1762_v54 = vld [vmem:[#allocation2 + $0x98] sm:$0xff] }
  0x1e   :  { %1252 = vmatmul.msk.f32.vlgmr.msra.gmra.mxu1 %vm84_vm0, %v1574_v4  ;;  %412 = vmatpush.msrb.mxu2 %v1682_v36  ;;  %v1750_v52 = vld [vmem:[#allocation2 + $0xc8] sm:$0xff]  ;;  %v1770_v55 = vld [vmem:[%s2340_s0 + $0x30] sm:$0xff]  ;;  %v1773_v56 = vld [vmem:[#allocation2 + $0x80] sm:$0xff] }
  0x1f   :  { %293 = vmatpush.msra.mxu3 %v1623_v19  ;;  %331 = vmatpush.msrb.mxu0 %v1638_v23  ;;  %v1782_v57 = vld [vmem:[#allocation2 + $0x68] sm:$0xff]  ;;  %v1788_v58 = vld [vmem:[#allocation2 + $0x50] sm:$0xff]  ;;  %v1794_v59 = vld [vmem:[#allocation2 + $0x38] sm:$0xff] }
  0x20   :  { %1246 = vmatmul.msk.f32.gmra.mxu0 %vm84_vm0, %v1629_v20  ;;  %392 = vmatpush.msrb.mxu1 %v1563_v1  ;;  %2375 = vst [vmem:[#allocation17_spill] sm:$0xff] %v1788_v58  ;;  %v1802_v60 = vld [vmem:[%s2340_s0 + $0x38] sm:$0xff]  ;;  %v1805_v61 = vld [vmem:[#allocation2 + $0x20] sm:$0xff]  ;;  %v1814_v62 = vld [vmem:[#allocation2 + $0x8] sm:$0xff] }
  0x21   :  { %294 = vmatpush.msra.mxu3 %v1634_v22  ;;  %332 = vmatpush.msrb.mxu0 %v1646_v25  ;;  %2376 = vst [vmem:[#allocation18_spill] sm:$0xff] %v1794_v59  ;;  %v76_v0 = vld [vmem:[%s2344_s4] sm:$0x7] }
  0x22   :  { %393 = vmatpush.msrb.mxu1 %v1569_v3  ;;  %413 = vmatpush.msrb.mxu2 %v1692_v40  ;;  %2377 = vst [vmem:[#allocation19_spill] sm:$0xff] %v1805_v61  ;;  %v78_v2 = vperm.slane %v76_v0, 0 }
  0x23   :  { %295 = vmatpush.msra.mxu3 %v1642_v24  ;;  %333 = vmatpush.msrb.mxu0 %v1652_v27  ;;  %2378 = vst [vmem:[#allocation20_spill] sm:$0xff] %v1814_v62 }
  0x24   :  { %1261 = vmatmul.msk.f32.gmra.mxu2 %vm84_vm0, %v1601_v12  ;;  %394 = vmatpush.msrb.mxu1 %v1576_v5 }
  0x25   :  { %296 = vmatpush.msra.mxu3 %v1648_v26  ;;  %334 = vmatpush.msrb.mxu0 %v1663_v30 }
  0x26   :  { %414 = vmatpush.msrb.mxu2 %v1709_v45  ;;  %395 = vmatpush.msrb.mxu1 %v1581_v6 }
  0x27   :  { %297 = vmatpush.msra.mxu3 %v1654_v28  ;;  %335 = vmatpush.msrb.mxu0 %v1669_v32 }
  0x28   :  { %1247 = vmatmul.msk.f32.gmra.mxu0 %vm84_vm0, %v1660_v29  ;;  %1253 = vmatmul.msk.f32.gmra.mxu1 %vm84_vm0, %v1601_v12 }
  0x29   :  { %298 = vmatpush.msra.mxu3 %v1665_v31  ;;  %336 = vmatpush.msrb.mxu0 %v1680_v35 }
  0x2a   :  { %415 = vmatpush.msrb.mxu2 %v1719_v47  ;;  %396 = vmatpush.msrb.mxu1 %v1586_v8 }
  0x2b   :  { %299 = vmatpush.msra.mxu3 %v1673_v33  ;;  %337 = vmatpush.msrb.mxu0 %v1689_v38 }
  0x2c   :  { %300 = vmatmul.f32.vlgmr.msra.gmra.mxu3 %v1507_v39  ;;  %416 = vmatpush.msrb.mxu2 %v1724_v48 }
  0x2d   :  { %304 = vmatpush.msrb.mxu3 %v1682_v36  ;;  %338 = vmatpush.msrb.mxu0 %v1697_v42 }
  0x2e   :  { %397 = vmatpush.msrb.mxu1 %v1592_v10  ;;  %1262 = vmatmul.msk.f32.gmra.mxu2 %vm84_vm0, %v1629_v20 }
  0x2f   :  { %305 = vmatpush.msrb.mxu3 %v1692_v40  ;;  %339 = vmatpush.msrb.mxu0 %v1715_v46 }
  0x30   :  { %1248 = vmatmul.msk.f32.gmra.mxu0 %vm84_vm0, %v1703_v43  ;;  %398 = vmatpush.msrb.mxu1 %v1603_v13 }
  0x31   :  { %306 = vmatpush.msrb.mxu3 %v1709_v45  ;;  %500 = vmatpush.msra.mxu0 %v1563_v1 }
  0x32   :  { %417 = vmatpush.msrb.mxu2 %v1730_v49  ;;  %399 = vmatpush.msrb.mxu1 %v1611_v15 }
  0x33   :  { %307 = vmatpush.msrb.mxu3 %v1719_v47  ;;  %501 = vmatpush.msra.mxu0 %v1569_v3 }
  0x34   :  { %1254 = vmatmul.msk.f32.gmra.mxu1 %vm84_vm0, %v1629_v20  ;;  %418 = vmatpush.msrb.mxu2 %v1741_v51 }
  0x35   :  { %308 = vmatpush.msrb.mxu3 %v1724_v48  ;;  %502 = vmatpush.msra.mxu0 %v1576_v5 }
  0x36   :  { %400 = vmatpush.msrb.mxu1 %v1617_v17  ;;  %419 = vmatpush.msrb.mxu2 %v1750_v52 }
  0x37   :  { %309 = vmatpush.msrb.mxu3 %v1730_v49  ;;  %503 = vmatpush.msra.mxu0 %v1581_v6 }
  0x38   :  { %1249 = vmatmul.msk.f32.gmra.mxu0 %vm84_vm0, %v1738_v50  ;;  %401 = vmatpush.msrb.mxu1 %v1623_v19 }
  0x39   :  { %310 = vmatpush.msrb.mxu3 %v1741_v51  ;;  %504 = vmatpush.msra.mxu0 %v1586_v8 }
  0x3a   :  { %1263 = vmatmul.msk.f32.gmra.mxu2 %vm84_vm0, %v1660_v29  ;;  %402 = vmatpush.msrb.mxu1 %v1634_v22 }
  0x3b   :  { %311 = vmatpush.msrb.mxu3 %v1750_v52  ;;  %420 = vmatpush.msrb.mxu2 %v1756_v53 }
  0x3c   :  { %403 = vmatpush.msrb.mxu1 %v1642_v24  ;;  %505 = vmatpush.msra.mxu0 %v1592_v10 }
  0x3d   :  { %312 = vmatpush.msrb.mxu3 %v1756_v53  ;;  %1255 = vmatmul.msk.f32.gmra.mxu1 %vm84_vm0, %v1660_v29 }
  0x3e   :  { %421 = vmatpush.msrb.mxu2 %v1762_v54  ;;  %404 = vmatpush.msrb.mxu1 %v1648_v26 }
  0x3f   :  { %313 = vmatpush.msrb.mxu3 %v1762_v54  ;;  %506 = vmatpush.msra.mxu0 %v1603_v13 }
  0x40   :  { %1250 = vmatmul.msk.f32.gmra.mxu0 %vm84_vm0, %v1770_v55  ;;  %422 = vmatpush.msrb.mxu2 %v1773_v56 }
  0x41   :  { %314 = vmatpush.msrb.mxu3 %v1773_v56  ;;  %405 = vmatpush.msrb.mxu1 %v1654_v28 }
  0x42   :  { %1264 = vmatmul.msk.f32.gmra.mxu2 %vm84_vm0, %v1703_v43  ;;  %507 = vmatpush.msra.mxu0 %v1611_v15 }
  0x43   :  { %315 = vmatpush.msrb.mxu3 %v1782_v57  ;;  %423 = vmatpush.msrb.mxu2 %v1782_v57 }
  0x44   :  { %406 = vmatpush.msrb.mxu1 %v1665_v31  ;;  %508 = vmatpush.msra.mxu0 %v1617_v17 }
  0x45   :  { %316 = vmatpush.msrb.mxu3 %v1788_v58  ;;  %1256 = vmatmul.msk.f32.gmra.mxu1 %vm84_vm0, %v1703_v43 }
  0x46   :  { %424 = vmatpush.msrb.mxu2 %v1788_v58  ;;  %407 = vmatpush.msrb.mxu1 %v1673_v33 }
  0x47   :  { %317 = vmatpush.msrb.mxu3 %v1794_v59  ;;  %509 = vmatpush.msra.mxu0 %v1623_v19 }
  0x48   :  { %1251 = vmatmul.msk.f32.gmra.mxu0 %vm84_vm0, %v1802_v60  ;;  %520 = vmatpush.msra.mxu1 %v1682_v36 }
  0x49   :  { %318 = vmatpush.msrb.mxu3 %v1805_v61  ;;  %425 = vmatpush.msrb.mxu2 %v1794_v59 }
  0x4a   :  { %521 = vmatpush.msra.mxu1 %v1692_v40  ;;  %1265 = vmatmul.msk.f32.gmra.mxu2 %vm84_vm0, %v1738_v50 }
  0x4b   :  { %319 = vmatpush.msrb.mxu3 %v1814_v62  ;;  %426 = vmatpush.msrb.mxu2 %v1805_v61 }
  0x4c   :  { %320 = vmatmul.f32.vlgmr.msrb.gmra.mxu3 %v1507_v39  ;;  %522 = vmatpush.msra.mxu1 %v1709_v45 }
  0x4d   :  { %432 = vmatpush.msra.mxu3 %v1584_v7  ;;  %1257 = vmatmul.msk.f32.gmra.mxu1 %vm84_vm0, %v1738_v50 }
  0x4e   :  { %427 = vmatpush.msrb.mxu2 %v1814_v62  ;;  %523 = vmatpush.msra.mxu1 %v1719_v47 }
  0x4f   :  { %433 = vmatpush.msra.mxu3 %v1590_v9  ;;  %510 = vmatpush.msra.mxu0 %v1634_v22 }
  0x50   :  { %340 = vmatmul.f32.vlgmr.msrb.gmra.mxu0 %v1507_v39  ;;  %540 = vmatpush.msra.mxu2 %v1584_v7 }
  0x51   :  { %434 = vmatpush.msra.mxu3 %v1595_v11  ;;  %524 = vmatpush.msra.mxu1 %v1724_v48 }
  0x52   :  { %541 = vmatpush.msra.mxu2 %v1590_v9  ;;  %511 = vmatpush.msra.mxu0 %v1642_v24 }
  0x53   :  { %435 = vmatpush.msra.mxu3 %v1606_v14  ;;  %1266 = vmatmul.msk.f32.gmra.mxu2 %vm84_vm0, %v1770_v55 }
  0x54   :  { %525 = vmatpush.msra.mxu1 %v1730_v49  ;;  %542 = vmatpush.msra.mxu2 %v1595_v11 }
  0x55   :  { %436 = vmatpush.msra.mxu3 %v1613_v16  ;;  %1258 = vmatmul.msk.f32.gmra.mxu1 %vm84_vm0, %v1770_v55 }
  0x56   :  { %526 = vmatpush.msra.mxu1 %v1741_v51  ;;  %543 = vmatpush.msra.mxu2 %v1606_v14 }
  0x57   :  { %437 = vmatpush.msra.mxu3 %v1619_v18  ;;  %512 = vmatpush.msra.mxu0 %v1648_v26 }
  0x58   :  { %527 = vmatpush.msra.mxu1 %v1750_v52  ;;  %544 = vmatpush.msra.mxu2 %v1613_v16 }
  0x59   :  { %438 = vmatpush.msra.mxu3 %v1632_v21  ;;  %513 = vmatpush.msra.mxu0 %v1654_v28 }
  0x5a   :  { %528 = vmatpush.msra.mxu1 %v1756_v53  ;;  %545 = vmatpush.msra.mxu2 %v1619_v18 }
  0x5b   :  { %439 = vmatpush.msra.mxu3 %v1638_v23  ;;  %1267 = vmatmul.msk.f32.gmra.mxu2 %vm84_vm0, %v1802_v60 }
  0x5c   :  { %529 = vmatpush.msra.mxu1 %v1762_v54  ;;  %514 = vmatpush.msra.mxu0 %v1665_v31 }
  0x5d   :  { %440 = vmatpush.msra.mxu3 %v1646_v25  ;;  %1259 = vmatmul.msk.f32.gmra.mxu1 %vm84_vm0, %v1802_v60 }
  0x5e   :  { %530 = vmatpush.msra.mxu1 %v1773_v56  ;;  %546 = vmatpush.msra.mxu2 %v1632_v21 }
  0x5f   :  { %441 = vmatpush.msra.mxu3 %v1652_v27  ;;  %515 = vmatpush.msra.mxu0 %v1673_v33 }
  0x60   :  { %531 = vmatpush.msra.mxu1 %v1782_v57  ;;  %547 = vmatpush.msra.mxu2 %v1638_v23 }
  0x61   :  { %442 = vmatpush.msra.mxu3 %v1663_v30  ;;  %628 = vmatpush.msrb.mxu0 %v1682_v36 }
  0x62   :  { %532 = vmatpush.msra.mxu1 %v1788_v58  ;;  %548 = vmatpush.msra.mxu2 %v1646_v25 }
  0x63   :  { %443 = vmatpush.msra.mxu3 %v1669_v32  ;;  %629 = vmatpush.msrb.mxu0 %v1692_v40 }
  0x64   :  { %533 = vmatpush.msra.mxu1 %v1794_v59  ;;  %549 = vmatpush.msra.mxu2 %v1652_v27 }
  0x65   :  { %444 = vmatpush.msra.mxu3 %v1680_v35  ;;  %630 = vmatpush.msrb.mxu0 %v1709_v45 }
  0x66   :  { %534 = vmatpush.msra.mxu1 %v1805_v61  ;;  %550 = vmatpush.msra.mxu2 %v1663_v30 }
  0x67   :  { %445 = vmatpush.msra.mxu3 %v1689_v38  ;;  %631 = vmatpush.msrb.mxu0 %v1719_v47 }
  0x68   :  { %535 = vmatpush.msra.mxu1 %v1814_v62  ;;  %551 = vmatpush.msra.mxu2 %v1669_v32 }
  0x69   :  { %446 = vmatpush.msra.mxu3 %v1697_v42  ;;  %632 = vmatpush.msrb.mxu0 %v1724_v48 }
  0x6a   :  { %552 = vmatpush.msra.mxu2 %v1680_v35 }
  0x6b   :  { %447 = vmatpush.msra.mxu3 %v1715_v46  ;;  %633 = vmatpush.msrb.mxu0 %v1730_v49 }
  0x6c   :  { %553 = vmatpush.msra.mxu2 %v1689_v38 }
  0x6d   :  { %608 = vmatpush.msrb.mxu3 %v1563_v1  ;;  %634 = vmatpush.msrb.mxu0 %v1741_v51 }
  0x6e   :  { %554 = vmatpush.msra.mxu2 %v1697_v42 }
  0x6f   :  { %609 = vmatpush.msrb.mxu3 %v1569_v3  ;;  %635 = vmatpush.msrb.mxu0 %v1750_v52 }
  0x70   :  { %555 = vmatpush.msra.mxu2 %v1715_v46 }
  0x71   :  { %610 = vmatpush.msrb.mxu3 %v1576_v5  ;;  %636 = vmatpush.msrb.mxu0 %v1756_v53 }
  0x73   :  { %611 = vmatpush.msrb.mxu3 %v1581_v6  ;;  %637 = vmatpush.msrb.mxu0 %v1762_v54 }
  0x75   :  { %612 = vmatpush.msrb.mxu3 %v1586_v8  ;;  %638 = vmatpush.msrb.mxu0 %v1773_v56 }
  0x77   :  { %613 = vmatpush.msrb.mxu3 %v1592_v10  ;;  %639 = vmatpush.msrb.mxu0 %v1782_v57 }
  0x79   :  { %614 = vmatpush.msrb.mxu3 %v1603_v13  ;;  %640 = vmatpush.msrb.mxu0 %v1788_v58 }
  0x7b   :  { %615 = vmatpush.msrb.mxu3 %v1611_v15  ;;  %641 = vmatpush.msrb.mxu0 %v1794_v59 }
  0x7d   :  { %616 = vmatpush.msrb.mxu3 %v1617_v17  ;;  %642 = vmatpush.msrb.mxu0 %v1805_v61 }
  0x7f   :  { %617 = vmatpush.msrb.mxu3 %v1623_v19  ;;  %643 = vmatpush.msrb.mxu0 %v1814_v62 }
  0x81   :  { %618 = vmatpush.msrb.mxu3 %v1634_v22 }
  0x83   :  { %619 = vmatpush.msrb.mxu3 %v1642_v24 }
  0x85   :  { %620 = vmatpush.msrb.mxu3 %v1648_v26 }
  0x87   :  { %621 = vmatpush.msrb.mxu3 %v1654_v28 }
  0x89   :  { %622 = vmatpush.msrb.mxu3 %v1665_v31 }
  0x8b   :  { %623 = vmatpush.msrb.mxu3 %v1673_v33 }
  0x8d   :  { %v126_v63 = vpop.f32.mrf.mxu0 }
  0x8e   :  { %v127_v41 = vadd.f32 %v126_v63, %v78_v2 }
  0x95   :  { %v129_v4 = vpop.f32.mrf.mxu0 }
  0x96   :  { %v1944_v12 = vadd.f32 %v129_v4, %v78_v2 }
  0x98   :  { %2379 = vst [vmem:[#allocation21_spill] sm:$0xff] %v1944_v12 }
  0x9b   :  { %v167_v63 = vpop.f32.mrf.mxu1 }
  0x9d   :  { %v132_v20 = vpop.f32.mrf.mxu0 }
  0x9e   :  { %v1946_v29 = vadd.f32 %v132_v20, %v78_v2 }
  0xa0   :  { %2380 = vst [vmem:[#allocation22_spill] sm:$0xff] %v1946_v29 }
  0xa5   :  { %v135_v34 = vpop.f32.mrf.mxu0 }
  0xa6   :  { %v1948_v37 = vadd.f32 %v135_v34, %v78_v2 }
  0xa8   :  { %2381 = vst [vmem:[#allocation23_spill] sm:$0xff] %v1948_v37  ;;  %v1958_v37 = vperm.slane %v76_v0, 1 }
  0xaa   :  { %2386 = vst [vmem:[#allocation28_spill] sm:$0xff] %v1958_v37 }
  0xad   :  { %v138_v39 = vpop.f32.mrf.mxu0 }
  0xae   :  { %v1950_v43 = vadd.f32 %v138_v39, %v78_v2 }
  0xaf   :  { %v301_v44 = vpop.f32.mrf.mxu3 }
  0xb0   :  { %2382 = vst [vmem:[#allocation24_spill] sm:$0xff] %v1950_v43  ;;  %v344_v50 = vadd.f32 %v301_v44, %v127_v41  ;;  %v168_v41 = vadd.f32 %v167_v63, %v1958_v37 }
  0xb2   :  { %v1268_v55 = vmul.f32 -1.442695, %v344_v50 }
  0xb4   :  { %1294 = vpow2.f32 %v1268_v55 }
  0xb5   :  { %v141_v60 = vpop.f32.mrf.mxu0 }
  0xb6   :  { %v1952_v62 = vadd.f32 %v141_v60, %v78_v2 }
  0xb8   :  { %2383 = vst [vmem:[#allocation25_spill] sm:$0xff] %v1952_v62 }
  0xba   :  { %v1295_v33 = vpop.eup %1294 }
  0xbb   :  { %v348_v20 = vadd.f32 1.0, %v1295_v33  ;;  %v1964_v33 = vld [vmem:[%s2345_s5] ss:$0 sm:$0xff] }
  0xbd   :  { %v144_v4 = vpop.f32.mrf.mxu0  ;;  %1296 = vrcp.f32 %v348_v20  ;;  %vm354_vm2 = vweird.f32 %v348_v20 }
  0xbe   :  { %v1954_v12 = vadd.f32 %v144_v4, %v78_v2 }
  0xc0   :  { %2384 = vst [vmem:[#allocation26_spill] sm:$0xff] %v1954_v12  ;;  %v358_v12 = vand.u32 2147483647, %v348_v20 }
  0xc2   :  { %vm359_vm4 = vcmp.eq.f32.partialorder %v358_v12, 8.507059e+37 }
  0xc3   :  { %v1297_v39 = vpop.eup %1296 }
  0xc4   :  { %v350_v44 = vmul.f32 %v1297_v39, %v348_v20  ;;  %vm355_vm1 = vweird.f32 %v1297_v39 }
  0xc5   :  { %v147_v29 = vpop.f32.mrf.mxu0  ;;  %vm356_vm3 = vmor %vm354_vm2, %vm355_vm1 }
  0xc6   :  { %v1956_v34 = vadd.f32 %v147_v29, %v78_v2  ;;  %v351_v62 = vsub.f32 1.0, %v350_v44  ;;  %v1967_v44 = vperm.slane %v76_v0, 2 }
  0xc8   :  { %2385 = vst [vmem:[#allocation27_spill] sm:$0xff] %v1956_v34  ;;  %v352_v43 = vmul.f32 %v1297_v39, %v351_v62  ;;  %v360_v34 = vand.u32 2147483648, %v348_v20 }
  0xca   :  { %v353_v2 = vadd.f32 %v1297_v39, %v352_v43  ;;  %v361_v62 = vor.u32 1.1754944e-38, %v360_v34 }
  0xcc   :  { %v357_v37 = vsel %vm356_vm3, %v1297_v39, %v353_v2 }
  0xcd   :  { %v341_v4 = vpop.f32.mrf.mxu0 }
  0xcf   :  { %v321_v50 = vpop.f32.mrf.mxu3 }
  0xd0   :  { %v364_v60 = vadd.f32 %v321_v50, %v168_v41  ;;  %v384_v41 = vadd.f32 %v1964_v33, %v341_v4  ;;  %v208_v50 = vpop.f32.mrf.mxu2 }
  0xd1   :  { %v209_v43 = vadd.f32 %v208_v50, %v1967_v44 }
  0xd2   :  { %v1269_v55 = vmul.f32 -1.442695, %v364_v60  ;;  %v362_v60 = vsel %vm359_vm4, %v361_v62, %v357_v37 }
  0xd4   :  { %1298 = vpow2.f32 %v1269_v55  ;;  %v385_v55 = vmul.f32 %v384_v41, %v362_v60  ;;  %v2392_v60 = vld [vmem:[#allocation20_spill] sm:$0xff] }
  0xd6   :  { %v386_v31 = vadd.f32 %v385_v55, %v209_v43  ;;  %v170_v55 = vpop.f32.mrf.mxu1 }
  0xd8   :  { %v211_v43 = vpop.f32.mrf.mxu2 }
  0xda   :  { %v1299_v29 = vpop.eup %1298 }
  0xdb   :  { %v368_v63 = vadd.f32 1.0, %v1299_v29 }
  0xdd   :  { %1300 = vrcp.f32 %v368_v63  ;;  %v380_v20 = vand.u32 2147483648, %v368_v63  ;;  %v378_v39 = vand.u32 2147483647, %v368_v63  ;;  %vm374_vm6 = vweird.f32 %v368_v63 }
  0xde   :  { %1302 = vtanh.f32 %v386_v31  ;;  %v2387_v31 = vld [vmem:[#allocation15_spill] sm:$0xff] }
  0xdf   :  { %v381_v0 = vor.u32 1.1754944e-38, %v380_v20  ;;  %vm379_vm8 = vcmp.eq.f32.partialorder %v378_v39, 8.507059e+37  ;;  %v2023_v20 = vpop.f32.mrf.mxu1 }
  0xe0   :  { %2393 = vst [vmem:[#allocation29_spill] sm:$0xff] %v2023_v20 }
  0xe3   :  { %v1301_v46 = vpop.eup %1300 }
  0xe4   :  { %v370_v61 = vmul.f32 %v1301_v46, %v368_v63  ;;  %vm375_vm5 = vweird.f32 %v1301_v46  ;;  %v1303_v4 = vpop.eup %1302  ;;  %v2391_v63 = vld [vmem:[#allocation13_spill] sm:$0xff] }
  0xe5   :  { %vm376_vm7 = vmor %vm374_vm6, %vm375_vm5 }
  0xe6   :  { %v371_v42 = vsub.f32 1.0, %v370_v61  ;;  %v2390_v61 = vld [vmem:[#allocation16_spill] sm:$0xff] }
  0xe7   :  { %v2027_v39 = vpop.f32.mrf.mxu1 }
  0xe8   :  { %v372_v29 = vmul.f32 %v1301_v46, %v371_v42  ;;  %v2388_v42 = vld [vmem:[#allocation12_spill] sm:$0xff]  ;;  %2395 = vst [vmem:[#allocation31_spill] sm:$0xff] %v2027_v39  ;;  %v2405_v39 = vld [vmem:[#allocation21_spill] sm:$0xff] }
  0xea   :  { %v373_v2 = vadd.f32 %v1301_v46, %v372_v29  ;;  %v2025_v29 = vpop.f32.mrf.mxu2 }
  0xeb   :  { %2394 = vst [vmem:[#allocation30_spill] sm:$0xff] %v2025_v29 }
  0xec   :  { %v377_v34 = vsel %vm376_vm7, %v1301_v46, %v373_v2  ;;  %v2389_v46 = vld [vmem:[#allocation19_spill] sm:$0xff] }
  0xed   :  { %v382_v12 = vsel %vm379_vm8, %v381_v0, %v377_v34 }
  0xee   :  { %v388_v37 = vsub.f32 1.0, %v382_v12  ;;  %v390_v62 = vmul.f32 0.0, %v382_v12 }
  0xef   :  { %v2031_v0 = vpop.f32.mrf.mxu1 }
  0xf0   :  { %v389_v41 = vmul.f32 %v1303_v4, %v388_v37  ;;  %2397 = vst [vmem:[#allocation33_spill] sm:$0xff] %v2031_v0 }
  0xf2   :  { %v1970_v50 = vadd.f32 %v390_v62, %v389_v41  ;;  %v2029_v2 = vpop.f32.mrf.mxu2 }
  0xf3   :  { %2396 = vst [vmem:[#allocation32_spill] sm:$0xff] %v2029_v2 }
  0xf4   :  { %408 = vmatmul.f32.vlgmr.msrb.gmra.mxu1 %v1970_v50  ;;  %428 = vmatmul.f32.vlgmr.msrb.gmra.mxu2 %v1970_v50 }
  0xf5   :  { %448 = vmatmul.f32.vlgmr.msra.gmra.mxu3 %v1970_v50  ;;  %648 = vmatpush.msrb.mxu1 %v1584_v7 }
  0xf6   :  { %716 = vmatpush.msrb.mxu2 %v1563_v1  ;;  %736 = vmatpush.msra.mxu3 %v1682_v36 }
  0xf7   :  { %649 = vmatpush.msrb.mxu1 %v1590_v9  ;;  %v2035_v12 = vpop.f32.mrf.mxu1 }
  0xf8   :  { %717 = vmatpush.msrb.mxu2 %v1569_v3  ;;  %737 = vmatpush.msra.mxu3 %v1692_v40  ;;  %2399 = vst [vmem:[#allocation35_spill] sm:$0xff] %v2035_v12 }
  0xf9   :  { %650 = vmatpush.msrb.mxu1 %v1595_v11 }
  0xfa   :  { %718 = vmatpush.msrb.mxu2 %v1576_v5  ;;  %738 = vmatpush.msra.mxu3 %v1709_v45  ;;  %v2033_v34 = vpop.f32.mrf.mxu2 }
  0xfb   :  { %651 = vmatpush.msrb.mxu1 %v1606_v14  ;;  %2398 = vst [vmem:[#allocation34_spill] sm:$0xff] %v2033_v34 }
  0xfc   :  { %719 = vmatpush.msrb.mxu2 %v1581_v6  ;;  %739 = vmatpush.msra.mxu3 %v1719_v47 }
  0xfd   :  { %652 = vmatpush.msrb.mxu1 %v1613_v16 }
  0xfe   :  { %720 = vmatpush.msrb.mxu2 %v1586_v8  ;;  %740 = vmatpush.msra.mxu3 %v1724_v48 }
  0xff   :  { %653 = vmatpush.msrb.mxu1 %v1619_v18  ;;  %v2039_v4 = vpop.f32.mrf.mxu1 }
 0x100   :  { %721 = vmatpush.msrb.mxu2 %v1592_v10  ;;  %741 = vmatpush.msra.mxu3 %v1730_v49  ;;  %2401 = vst [vmem:[#allocation37_spill] sm:$0xff] %v2039_v4 }
 0x101   :  { %654 = vmatpush.msrb.mxu1 %v1632_v21 }
 0x102   :  { %722 = vmatpush.msrb.mxu2 %v1603_v13  ;;  %742 = vmatpush.msra.mxu3 %v1741_v51  ;;  %v2037_v37 = vpop.f32.mrf.mxu2 }
 0x103   :  { %655 = vmatpush.msrb.mxu1 %v1638_v23  ;;  %2400 = vst [vmem:[#allocation36_spill] sm:$0xff] %v2037_v37 }
 0x104   :  { %723 = vmatpush.msrb.mxu2 %v1611_v15  ;;  %743 = vmatpush.msra.mxu3 %v1750_v52 }
 0x105   :  { %656 = vmatpush.msrb.mxu1 %v1646_v25 }
 0x106   :  { %724 = vmatpush.msrb.mxu2 %v1617_v17  ;;  %744 = vmatpush.msra.mxu3 %v1756_v53 }
 0x107   :  { %657 = vmatpush.msrb.mxu1 %v1652_v27  ;;  %v2043_v62 = vpop.f32.mrf.mxu1 }
 0x108   :  { %725 = vmatpush.msrb.mxu2 %v1623_v19  ;;  %745 = vmatpush.msra.mxu3 %v1762_v54  ;;  %2403 = vst [vmem:[#allocation39_spill] sm:$0xff] %v2043_v62 }
 0x109   :  { %658 = vmatpush.msrb.mxu1 %v1663_v30 }
 0x10a   :  { %726 = vmatpush.msrb.mxu2 %v1634_v22  ;;  %746 = vmatpush.msra.mxu3 %v1773_v56  ;;  %v2041_v41 = vpop.f32.mrf.mxu2 }
 0x10b   :  { %659 = vmatpush.msrb.mxu1 %v1669_v32  ;;  %2402 = vst [vmem:[#allocation38_spill] sm:$0xff] %v2041_v41 }
 0x10c   :  { %727 = vmatpush.msrb.mxu2 %v1642_v24  ;;  %747 = vmatpush.msra.mxu3 %v1782_v57 }
 0x10d   :  { %660 = vmatpush.msrb.mxu1 %v1680_v35 }
 0x10e   :  { %728 = vmatpush.msrb.mxu2 %v1648_v26  ;;  %748 = vmatpush.msra.mxu3 %v1788_v58 }
 0x10f   :  { %661 = vmatpush.msrb.mxu1 %v1689_v38 }
 0x110   :  { %729 = vmatpush.msrb.mxu2 %v1654_v28  ;;  %749 = vmatpush.msra.mxu3 %v1794_v59 }
 0x111   :  { %662 = vmatpush.msrb.mxu1 %v2387_v31 }
 0x112   :  { %730 = vmatpush.msrb.mxu2 %v2388_v42  ;;  %750 = vmatpush.msra.mxu3 %v2389_v46  ;;  %v2045_v20 = vpop.f32.mrf.mxu2 }
 0x113   :  { %663 = vmatpush.msrb.mxu1 %v2390_v61  ;;  %2404 = vst [vmem:[#allocation40_spill] sm:$0xff] %v2045_v20 }
 0x114   :  { %731 = vmatpush.msrb.mxu2 %v2391_v63  ;;  %751 = vmatpush.msra.mxu3 %v2392_v60  ;;  %v2406_v63 = vld [vmem:[#allocation28_spill] sm:$0xff] }
 0x115   :  { %v171_v0 = vadd.f32 %v170_v55, %v2406_v63 }
 0x171   :  { %v409_v29 = vpop.f32.mrf.mxu1 }
 0x172   :  { %v452_v60 = vadd.f32 %v409_v29, %v2405_v39 }
 0x174   :  { %v1270_v2 = vmul.f32 -1.442695, %v452_v60 }
 0x176   :  { %1304 = vpow2.f32 %v1270_v2 }
 0x177   :  { %v429_v34 = vpop.f32.mrf.mxu2 }
 0x178   :  { %v472_v61 = vadd.f32 %v429_v34, %v171_v0  ;;  %v449_v55 = vpop.f32.mrf.mxu3 }
 0x179   :  { %v492_v34 = vadd.f32 %v1964_v33, %v449_v55 }
 0x17a   :  { %v1271_v12 = vmul.f32 -1.442695, %v472_v61 }
 0x17c   :  { %v1305_v46 = vpop.eup %1304  ;;  %1306 = vpow2.f32 %v1271_v12  ;;  %v212_v12 = vadd.f32 %v211_v43, %v1967_v44 }
 0x17d   :  { %v456_v37 = vadd.f32 1.0, %v1305_v46 }
 0x17f   :  { %1308 = vrcp.f32 %v456_v37  ;;  %v468_v31 = vand.u32 2147483648, %v456_v37  ;;  %v466_v60 = vand.u32 2147483647, %v456_v37  ;;  %vm462_vm10 = vweird.f32 %v456_v37 }
 0x181   :  { %v469_v61 = vor.u32 1.1754944e-38, %v468_v31  ;;  %vm467_vm12 = vcmp.eq.f32.partialorder %v466_v60, 8.507059e+37 }
 0x182   :  { %v1307_v4 = vpop.eup %1306 }
 0x183   :  { %v476_v41 = vadd.f32 1.0, %v1307_v4 }
 0x185   :  { %v1309_v42 = vpop.eup %1308  ;;  %1310 = vrcp.f32 %v476_v41  ;;  %v486_v28 = vand.u32 2147483647, %v476_v41  ;;  %vm482_vm14 = vweird.f32 %v476_v41 }
 0x186   :  { %v458_v62 = vmul.f32 %v1309_v42, %v456_v37  ;;  %vm463_vm9 = vweird.f32 %v1309_v42 }
 0x187   :  { %vm464_vm11 = vmor %vm462_vm10, %vm463_vm9  ;;  %vm487_vm0 = vcmp.eq.f32.partialorder %v486_v28, 8.507059e+37 }
 0x188   :  { %v459_v20 = vsub.f32 1.0, %v458_v62 }
 0x18a   :  { %v460_v59 = vmul.f32 %v1309_v42, %v459_v20  ;;  %v488_v20 = vand.u32 2147483648, %v476_v41 }
 0x18b   :  { %v1311_v29 = vpop.eup %1310 }
 0x18c   :  { %v478_v39 = vmul.f32 %v1311_v29, %v476_v41  ;;  %v461_v2 = vadd.f32 %v1309_v42, %v460_v59  ;;  %vm483_vm13 = vweird.f32 %v1311_v29  ;;  %v489_v31 = vor.u32 1.1754944e-38, %v488_v20  ;;  %v2420_v20 = vld [vmem:[#allocation30_spill] sm:$0xff] }
 0x18d   :  { %vm484_vm15 = vmor %vm482_vm14, %vm483_vm13 }
 0x18e   :  { %v479_v0 = vsub.f32 1.0, %v478_v39  ;;  %v465_v46 = vsel %vm464_vm11, %v1309_v42, %v461_v2 }
 0x18f   :  { %v470_v4 = vsel %vm467_vm12, %v469_v61, %v465_v46 }
 0x190   :  { %v480_v62 = vmul.f32 %v1311_v29, %v479_v0  ;;  %v493_v63 = vmul.f32 %v492_v34, %v470_v4 }
 0x192   :  { %v494_v38 = vadd.f32 %v493_v63, %v212_v12  ;;  %v481_v58 = vadd.f32 %v1311_v29, %v480_v62 }
 0x194   :  { %1312 = vtanh.f32 %v494_v38  ;;  %v485_v59 = vsel %vm484_vm15, %v1311_v29, %v481_v58 }
 0x195   :  { %v490_v42 = vsel %vm487_vm0, %v489_v31, %v485_v59  ;;  %v215_v59 = vadd.f32 %v2420_v20, %v1967_v44 }
 0x196   :  { %v496_v37 = vsub.f32 1.0, %v490_v42  ;;  %v498_v43 = vmul.f32 %v490_v42, %v1970_v50 }
 0x19a   :  { %v1313_v60 = vpop.eup %1312 }
 0x19b   :  { %v497_v55 = vmul.f32 %v1313_v60, %v496_v37 }
 0x19d   :  { %v2052_v39 = vadd.f32 %v498_v43, %v497_v55 }
 0x19f   :  { %516 = vmatmul.f32.vlgmr.msra.gmra.mxu0 %v2052_v39  ;;  %536 = vmatmul.f32.vlgmr.msra.gmra.mxu1 %v2052_v39 }
 0x1a0   :  { %556 = vmatmul.f32.vlgmr.msra.gmra.mxu2 %v2052_v39  ;;  %756 = vmatpush.msra.mxu0 %v1584_v7  ;;  %v2411_v7 = vld [vmem:[#allocation15_spill] sm:$0xff] }
 0x1a1   :  { %824 = vmatpush.msra.mxu1 %v1563_v1  ;;  %844 = vmatpush.msra.mxu2 %v1682_v36  ;;  %v2407_v1 = vld [vmem:[#allocation17_spill] sm:$0xff] }
 0x1a2   :  { %757 = vmatpush.msra.mxu0 %v1590_v9  ;;  %v2413_v9 = vld [vmem:[#allocation19_spill] sm:$0xff] }
 0x1a3   :  { %825 = vmatpush.msra.mxu1 %v1569_v3  ;;  %845 = vmatpush.msra.mxu2 %v1692_v40  ;;  %v2408_v3 = vld [vmem:[#allocation14_spill] sm:$0xff] }
 0x1a4   :  { %758 = vmatpush.msra.mxu0 %v1595_v11  ;;  %v2415_v11 = vld [vmem:[#allocation13_spill] sm:$0xff] }
 0x1a5   :  { %826 = vmatpush.msra.mxu1 %v1576_v5  ;;  %846 = vmatpush.msra.mxu2 %v1709_v45  ;;  %v2409_v5 = vld [vmem:[#allocation11_spill] sm:$0xff] }
 0x1a6   :  { %759 = vmatpush.msra.mxu0 %v1606_v14  ;;  %v2417_v14 = vld [vmem:[#allocation28_spill] sm:$0xff] }
 0x1a7   :  { %827 = vmatpush.msra.mxu1 %v1581_v6  ;;  %847 = vmatpush.msra.mxu2 %v1719_v47  ;;  %v2410_v6 = vld [vmem:[#allocation18_spill] sm:$0xff] }
 0x1a8   :  { %760 = vmatpush.msra.mxu0 %v1613_v16 }
 0x1a9   :  { %828 = vmatpush.msra.mxu1 %v1586_v8  ;;  %848 = vmatpush.msra.mxu2 %v1724_v48  ;;  %v2412_v8 = vld [vmem:[#allocation12_spill] sm:$0xff] }
 0x1aa   :  { %761 = vmatpush.msra.mxu0 %v1619_v18 }
 0x1ab   :  { %829 = vmatpush.msra.mxu1 %v1592_v10  ;;  %849 = vmatpush.msra.mxu2 %v1730_v49  ;;  %v2414_v10 = vld [vmem:[#allocation16_spill] sm:$0xff] }
 0x1ac   :  { %762 = vmatpush.msra.mxu0 %v1632_v21 }
 0x1ad   :  { %830 = vmatpush.msra.mxu1 %v1603_v13  ;;  %850 = vmatpush.msra.mxu2 %v1741_v51  ;;  %v2416_v13 = vld [vmem:[#allocation20_spill] sm:$0xff] }
 0x1ae   :  { %763 = vmatpush.msra.mxu0 %v1638_v23 }
 0x1af   :  { %831 = vmatpush.msra.mxu1 %v1611_v15  ;;  %851 = vmatpush.msra.mxu2 %v1750_v52  ;;  %v2418_v15 = vld [vmem:[#allocation29_spill] sm:$0xff] }
 0x1b0   :  { %764 = vmatpush.msra.mxu0 %v1646_v25  ;;  %v174_v16 = vadd.f32 %v2418_v15, %v2417_v14  ;;  %v2117_v15 = vld [vmem:[#allocation2 + $0x178] sm:$0xff] }
 0x1b1   :  { %832 = vmatpush.msra.mxu1 %v1617_v17  ;;  %852 = vmatpush.msra.mxu2 %v1756_v53 }
 0x1b2   :  { %765 = vmatpush.msra.mxu0 %v1652_v27 }
 0x1b3   :  { %833 = vmatpush.msra.mxu1 %v1623_v19  ;;  %853 = vmatpush.msra.mxu2 %v1762_v54  ;;  %v2419_v19 = vld [vmem:[#allocation22_spill] sm:$0xff] }
 0x1b4   :  { %766 = vmatpush.msra.mxu0 %v1663_v30 }
 0x1b5   :  { %834 = vmatpush.msra.mxu1 %v1634_v22  ;;  %854 = vmatpush.msra.mxu2 %v1773_v56 }
 0x1b6   :  { %767 = vmatpush.msra.mxu0 %v1669_v32 }
 0x1b7   :  { %835 = vmatpush.msra.mxu1 %v1642_v24  ;;  %855 = vmatpush.msra.mxu2 %v1782_v57 }
 0x1b8   :  { %768 = vmatpush.msra.mxu0 %v1680_v35 }
 0x1b9   :  { %836 = vmatpush.msra.mxu1 %v1648_v26  ;;  %856 = vmatpush.msra.mxu2 %v2407_v1 }
 0x1ba   :  { %769 = vmatpush.msra.mxu0 %v2408_v3 }
 0x1bb   :  { %837 = vmatpush.msra.mxu1 %v2409_v5  ;;  %857 = vmatpush.msra.mxu2 %v2410_v6 }
 0x1bc   :  { %770 = vmatpush.msra.mxu0 %v2411_v7 }
 0x1bd   :  { %838 = vmatpush.msra.mxu1 %v2412_v8  ;;  %858 = vmatpush.msra.mxu2 %v2413_v9 }
 0x1be   :  { %771 = vmatpush.msra.mxu0 %v2414_v10 }
 0x1bf   :  { %839 = vmatpush.msra.mxu1 %v2415_v11  ;;  %859 = vmatpush.msra.mxu2 %v2416_v13 }
 0x21c   :  { %v517_v17 = vpop.f32.mrf.mxu0  ;;  %v537_v18 = vpop.f32.mrf.mxu1 }
 0x21d   :  { %v560_v21 = vadd.f32 %v517_v17, %v2419_v19  ;;  %v580_v22 = vadd.f32 %v537_v18, %v174_v16  ;;  %v2120_v16 = vld [vmem:[#allocation2 + $0x168] sm:$0xff]  ;;  %v2124_v17 = vld [vmem:[#allocation2 + $0x160] sm:$0xff]  ;;  %v2134_v19 = vld [vmem:[#allocation2 + $0x138] sm:$0xff] }
 0x21e   :  { %v2131_v18 = vld [vmem:[#allocation2 + $0x148] sm:$0xff] }
 0x21f   :  { %v1272_v23 = vmul.f32 -1.442695, %v560_v21  ;;  %v1273_v24 = vmul.f32 -1.442695, %v580_v22  ;;  %v2141_v21 = vld [vmem:[#allocation2 + $0x120] sm:$0xff]  ;;  %v2148_v22 = vld [vmem:[#allocation2 + $0x108] sm:$0xff] }
 0x221   :  { %1314 = vpow2.f32 %v1272_v23  ;;  %v2155_v23 = vld [vmem:[#allocation2 + $0xf0] sm:$0xff] }
 0x222   :  { %1316 = vpow2.f32 %v1273_v24  ;;  %v2162_v24 = vld [vmem:[#allocation2 + $0xd8] sm:$0xff] }
 0x223   :  { %v557_v61 = vpop.f32.mrf.mxu2 }
 0x224   :  { %v600_v12 = vadd.f32 %v1964_v33, %v557_v61  ;;  %v2422_v61 = vld [vmem:[#allocation23_spill] sm:$0xff] }
 0x227   :  { %v1315_v25 = vpop.eup %1314 }
 0x228   :  { %v1317_v26 = vpop.eup %1316  ;;  %v564_v27 = vadd.f32 1.0, %v1315_v25  ;;  %v2169_v25 = vld [vmem:[#allocation2 + $0xc0] sm:$0xff] }
 0x229   :  { %v584_v28 = vadd.f32 1.0, %v1317_v26  ;;  %v2176_v26 = vld [vmem:[#allocation2 + $0xa8] sm:$0xff] }
 0x22a   :  { %1318 = vrcp.f32 %v564_v27  ;;  %v576_v63 = vand.u32 2147483648, %v564_v27  ;;  %v574_v29 = vand.u32 2147483647, %v564_v27  ;;  %vm570_vm2 = vweird.f32 %v564_v27 }
 0x22b   :  { %1320 = vrcp.f32 %v584_v28  ;;  %v596_v42 = vand.u32 2147483648, %v584_v28  ;;  %vm590_vm6 = vweird.f32 %v584_v28  ;;  %v594_v37 = vand.u32 2147483647, %v584_v28 }
 0x22c   :  { %v577_v46 = vor.u32 1.1754944e-38, %v576_v63  ;;  %vm575_vm4 = vcmp.eq.f32.partialorder %v574_v29, 8.507059e+37 }
 0x22d   :  { %v597_v43 = vor.u32 1.1754944e-38, %v596_v42  ;;  %vm595_vm8 = vcmp.eq.f32.partialorder %v594_v37, 8.507059e+37 }
 0x230   :  { %v1319_v30 = vpop.eup %1318 }
 0x231   :  { %v1321_v32 = vpop.eup %1320  ;;  %v566_v35 = vmul.f32 %v1319_v30, %v564_v27  ;;  %vm571_vm1 = vweird.f32 %v1319_v30  ;;  %v2183_v27 = vld [vmem:[#allocation2 + $0x90] sm:$0xff] }
 0x232   :  { %v586_v38 = vmul.f32 %v1321_v32, %v584_v28  ;;  %vm572_vm3 = vmor %vm570_vm2, %vm571_vm1  ;;  %vm591_vm5 = vweird.f32 %v1321_v32  ;;  %v2190_v28 = vld [vmem:[#allocation2 + $0x78] sm:$0xff] }
 0x233   :  { %v567_v58 = vsub.f32 1.0, %v566_v35  ;;  %vm592_vm7 = vmor %vm590_vm6, %vm591_vm5  ;;  %v2211_v35 = vld [vmem:[#allocation2 + $0x30] sm:$0xff] }
 0x234   :  { %v587_v50 = vsub.f32 1.0, %v586_v38  ;;  %v2218_v38 = vld [vmem:[#allocation2 + $0x18] sm:$0xff] }
 0x235   :  { %v568_v41 = vmul.f32 %v1319_v30, %v567_v58  ;;  %v2225_v58 = vld [vmem:[#allocation2] sm:$0xff] }
 0x236   :  { %v588_v2 = vmul.f32 %v1321_v32, %v587_v50 }
 0x237   :  { %v569_v0 = vadd.f32 %v1319_v30, %v568_v41 }
 0x238   :  { %v589_v62 = vadd.f32 %v1321_v32, %v588_v2 }
 0x239   :  { %v573_v34 = vsel %vm572_vm3, %v1319_v30, %v569_v0  ;;  %v2197_v30 = vld [vmem:[#allocation2 + $0x60] sm:$0xff] }
 0x23a   :  { %v578_v4 = vsel %vm575_vm4, %v577_v46, %v573_v34  ;;  %v593_v55 = vsel %vm592_vm7, %v1321_v32, %v589_v62  ;;  %v2204_v32 = vld [vmem:[#allocation2 + $0x48] sm:$0xff] }
 0x23b   :  { %v601_v31 = vmul.f32 %v600_v12, %v578_v4  ;;  %v598_v3 = vsel %vm595_vm8, %v597_v43, %v593_v55 }
 0x23c   :  { %v604_v5 = vsub.f32 1.0, %v598_v3  ;;  %v606_v10 = vmul.f32 %v598_v3, %v2052_v39  ;;  %v2127_v39 = vld [vmem:[#allocation2 + $0x150] sm:$0xff] }
 0x23d   :  { %v602_v60 = vadd.f32 %v601_v31, %v215_v59 }
 0x23f   :  { %1322 = vtanh.f32 %v602_v60 }
 0x245   :  { %v1323_v7 = vpop.eup %1322 }
 0x246   :  { %v605_v8 = vmul.f32 %v1323_v7, %v604_v5 }
 0x248   :  { %v2112_v11 = vadd.f32 %v606_v10, %v605_v8 }
 0x24a   :  { %624 = vmatmul.f32.vlgmr.msrb.gmra.mxu3 %v2112_v11  ;;  %644 = vmatmul.f32.vlgmr.msrb.gmra.mxu0 %v2112_v11 }
 0x24b   :  { %664 = vmatmul.f32.vlgmr.msrb.gmra.mxu1 %v2112_v11  ;;  %864 = vmatpush.msrb.mxu3 %v2117_v15 }
 0x24c   :  { %932 = vmatpush.msrb.mxu0 %v2120_v16  ;;  %952 = vmatpush.msrb.mxu1 %v1682_v36  ;;  %v2138_v36 = vld [vmem:[#allocation2 + $0x130] sm:$0xff] }
 0x24d   :  { %865 = vmatpush.msrb.mxu3 %v2124_v17 }
 0x24e   :  { %933 = vmatpush.msrb.mxu0 %v2127_v39  ;;  %953 = vmatpush.msrb.mxu1 %v1692_v40  ;;  %v2145_v40 = vld [vmem:[#allocation2 + $0x118] sm:$0xff] }
 0x24f   :  { %866 = vmatpush.msrb.mxu3 %v2131_v18 }
 0x250   :  { %934 = vmatpush.msrb.mxu0 %v2134_v19  ;;  %954 = vmatpush.msrb.mxu1 %v1709_v45  ;;  %v2152_v45 = vld [vmem:[#allocation2 + $0x100] sm:$0xff] }
 0x251   :  { %867 = vmatpush.msrb.mxu3 %v2138_v36 }
 0x252   :  { %935 = vmatpush.msrb.mxu0 %v2141_v21  ;;  %955 = vmatpush.msrb.mxu1 %v1719_v47  ;;  %v2159_v47 = vld [vmem:[#allocation2 + $0xe8] sm:$0xff] }
 0x253   :  { %868 = vmatpush.msrb.mxu3 %v2145_v40 }
 0x254   :  { %936 = vmatpush.msrb.mxu0 %v2148_v22  ;;  %956 = vmatpush.msrb.mxu1 %v1724_v48  ;;  %v2166_v48 = vld [vmem:[#allocation2 + $0xd0] sm:$0xff] }
 0x255   :  { %869 = vmatpush.msrb.mxu3 %v2152_v45 }
 0x256   :  { %937 = vmatpush.msrb.mxu0 %v2155_v23  ;;  %957 = vmatpush.msrb.mxu1 %v1730_v49  ;;  %v2173_v49 = vld [vmem:[#allocation2 + $0xb8] sm:$0xff] }
 0x257   :  { %870 = vmatpush.msrb.mxu3 %v2159_v47 }
 0x258   :  { %938 = vmatpush.msrb.mxu0 %v2162_v24  ;;  %958 = vmatpush.msrb.mxu1 %v1741_v51  ;;  %v2180_v51 = vld [vmem:[#allocation2 + $0xa0] sm:$0xff] }
 0x259   :  { %871 = vmatpush.msrb.mxu3 %v2166_v48 }
 0x25a   :  { %939 = vmatpush.msrb.mxu0 %v2169_v25  ;;  %959 = vmatpush.msrb.mxu1 %v1750_v52  ;;  %v2187_v52 = vld [vmem:[#allocation2 + $0x88] sm:$0xff] }
 0x25b   :  { %872 = vmatpush.msrb.mxu3 %v2173_v49 }
 0x25c   :  { %940 = vmatpush.msrb.mxu0 %v2176_v26  ;;  %960 = vmatpush.msrb.mxu1 %v1756_v53  ;;  %v2194_v53 = vld [vmem:[#allocation2 + $0x70] sm:$0xff] }
 0x25d   :  { %873 = vmatpush.msrb.mxu3 %v2180_v51 }
 0x25e   :  { %941 = vmatpush.msrb.mxu0 %v2183_v27  ;;  %961 = vmatpush.msrb.mxu1 %v1762_v54  ;;  %v2201_v54 = vld [vmem:[#allocation2 + $0x58] sm:$0xff] }
 0x25f   :  { %874 = vmatpush.msrb.mxu3 %v2187_v52 }
 0x260   :  { %942 = vmatpush.msrb.mxu0 %v2190_v28  ;;  %962 = vmatpush.msrb.mxu1 %v1773_v56  ;;  %v2208_v56 = vld [vmem:[#allocation2 + $0x40] sm:$0xff] }
 0x261   :  { %875 = vmatpush.msrb.mxu3 %v2194_v53 }
 0x262   :  { %943 = vmatpush.msrb.mxu0 %v2197_v30  ;;  %963 = vmatpush.msrb.mxu1 %v1782_v57  ;;  %v2215_v57 = vld [vmem:[#allocation2 + $0x28] sm:$0xff] }
 0x263   :  { %876 = vmatpush.msrb.mxu3 %v2201_v54 }
 0x264   :  { %944 = vmatpush.msrb.mxu0 %v2204_v32  ;;  %964 = vmatpush.msrb.mxu1 %v2407_v1  ;;  %v2222_v1 = vld [vmem:[#allocation2 + $0x10] sm:$0xff] }
 0x265   :  { %877 = vmatpush.msrb.mxu3 %v2208_v56 }
 0x266   :  { %945 = vmatpush.msrb.mxu0 %v2211_v35  ;;  %965 = vmatpush.msrb.mxu1 %v2410_v6  ;;  %v2421_v6 = vld [vmem:[#allocation31_spill] sm:$0xff] }
 0x267   :  { %878 = vmatpush.msrb.mxu3 %v2215_v57  ;;  %v177_v50 = vadd.f32 %v2421_v6, %v2417_v14 }
 0x268   :  { %946 = vmatpush.msrb.mxu0 %v2218_v38  ;;  %966 = vmatpush.msrb.mxu1 %v2413_v9 }
 0x269   :  { %879 = vmatpush.msrb.mxu3 %v2222_v1 }
 0x26a   :  { %947 = vmatpush.msrb.mxu0 %v2225_v58  ;;  %967 = vmatpush.msrb.mxu1 %v2416_v13 }
 0x2c7   :  { %v645_v63 = vpop.f32.mrf.mxu0 }
 0x2c8   :  { %v688_v41 = vadd.f32 %v645_v63, %v177_v50  ;;  %v665_v3 = vpop.f32.mrf.mxu1  ;;  %v2423_v63 = vld [vmem:[#allocation32_spill] sm:$0xff] }
 0x2c9   :  { %v708_v8 = vadd.f32 %v1964_v33, %v665_v3 }
 0x2ca   :  { %v1275_v29 = vmul.f32 -1.442695, %v688_v41  ;;  %v218_v41 = vadd.f32 %v2423_v63, %v1967_v44 }
 0x2cc   :  { %1324 = vpow2.f32 %v1275_v29 }
 0x2cd   :  { %v625_v2 = vpop.f32.mrf.mxu3 }
 0x2ce   :  { %v668_v9 = vadd.f32 %v625_v2, %v2422_v61 }
 0x2d0   :  { %v1274_v0 = vmul.f32 -1.442695, %v668_v9 }
 0x2d2   :  { %v1325_v46 = vpop.eup %1324  ;;  %1326 = vpow2.f32 %v1274_v0 }
 0x2d3   :  { %v692_v34 = vadd.f32 1.0, %v1325_v46 }
 0x2d5   :  { %1328 = vrcp.f32 %v692_v34  ;;  %v704_v29 = vand.u32 2147483648, %v692_v34  ;;  %vm698_vm14 = vweird.f32 %v692_v34  ;;  %v702_v61 = vand.u32 2147483647, %v692_v34 }
 0x2d7   :  { %v705_v46 = vor.u32 1.1754944e-38, %v704_v29  ;;  %vm703_vm0 = vcmp.eq.f32.partialorder %v702_v61, 8.507059e+37 }
 0x2d8   :  { %v1327_v12 = vpop.eup %1326 }
 0x2d9   :  { %v672_v4 = vadd.f32 1.0, %v1327_v12 }
 0x2db   :  { %1330 = vrcp.f32 %v672_v4  ;;  %v1329_v62 = vpop.eup %1328  ;;  %v684_v37 = vand.u32 2147483648, %v672_v4  ;;  %v682_v55 = vand.u32 2147483647, %v672_v4  ;;  %vm678_vm10 = vweird.f32 %v672_v4 }
 0x2dc   :  { %v694_v13 = vmul.f32 %v1329_v62, %v692_v34  ;;  %vm699_vm13 = vweird.f32 %v1329_v62  ;;  %v1406_v34 = vld [vmem:[#allocation2 + $0x170] sm:$0xff] }
 0x2dd   :  { %v685_v7 = vor.u32 1.1754944e-38, %v684_v37  ;;  %vm683_vm12 = vcmp.eq.f32.partialorder %v682_v55, 8.507059e+37  ;;  %vm700_vm15 = vmor %vm698_vm14, %vm699_vm13 }
 0x2de   :  { %v695_v31 = vsub.f32 1.0, %v694_v13 }
 0x2e0   :  { %v696_v43 = vmul.f32 %v1329_v62, %v695_v31 }
 0x2e1   :  { %v1331_v20 = vpop.eup %1330 }
 0x2e2   :  { %v674_v59 = vmul.f32 %v1331_v20, %v672_v4  ;;  %vm679_vm9 = vweird.f32 %v1331_v20  ;;  %v697_v50 = vadd.f32 %v1329_v62, %v696_v43 }
 0x2e3   :  { %vm680_vm11 = vmor %vm678_vm10, %vm679_vm9 }
 0x2e4   :  { %v675_v42 = vsub.f32 1.0, %v674_v59  ;;  %v701_v0 = vsel %vm700_vm15, %v1329_v62, %v697_v50  ;;  %v1407_v62 = vld [vmem:[#allocation2 + $0x158] sm:$0xff] }
 0x2e5   :  { %v706_v12 = vsel %vm703_vm0, %v705_v46, %v701_v0 }
 0x2e6   :  { %v676_v60 = vmul.f32 %v1331_v20, %v675_v42  ;;  %v712_v4 = vsub.f32 1.0, %v706_v12  ;;  %v714_v59 = vmul.f32 %v706_v12, %v2112_v11  ;;  %v1408_v11 = vld [vmem:[#allocation2 + $0x140] sm:$0xff]  ;;  %v1409_v42 = vld [vmem:[#allocation2 + $0x128] sm:$0xff] }
 0x2e8   :  { %v677_v5 = vadd.f32 %v1331_v20, %v676_v60 }
 0x2ea   :  { %v681_v10 = vsel %vm680_vm11, %v1331_v20, %v677_v5 }
 0x2eb   :  { %v686_v6 = vsel %vm683_vm12, %v685_v7, %v681_v10 }
 0x2ec   :  { %v709_v2 = vmul.f32 %v708_v8, %v686_v6 }
 0x2ee   :  { %v710_v9 = vadd.f32 %v709_v2, %v218_v41 }
 0x2f0   :  { %1332 = vtanh.f32 %v710_v9 }
 0x2f6   :  { %v1333_v13 = vpop.eup %1332 }
 0x2f7   :  { %v713_v20 = vmul.f32 %v1333_v13, %v712_v4 }
 0x2f9   :  { %v2236_v31 = vadd.f32 %v714_v59, %v713_v20 }
 0x2fb   :  { %732 = vmatmul.f32.vlgmr.msrb.gmra.mxu2 %v2236_v31  ;;  %752 = vmatmul.f32.vlgmr.msra.gmra.mxu3 %v2236_v31 }
 0x2fc   :  { %772 = vmatmul.f32.vlgmr.msra.gmra.mxu0 %v2236_v31  ;;  %972 = vmatpush.msrb.mxu2 %v2117_v15 }
 0x2fd   :  { %1040 = vmatpush.msra.mxu3 %v2120_v16  ;;  %1060 = vmatpush.msra.mxu0 %v1406_v34  ;;  %v1410_v16 = vld [vmem:[#allocation2 + $0x110] sm:$0xff] }
 0x2fe   :  { %973 = vmatpush.msrb.mxu2 %v2124_v17 }
 0x2ff   :  { %1041 = vmatpush.msra.mxu3 %v2127_v39  ;;  %1061 = vmatpush.msra.mxu0 %v1407_v62  ;;  %v1411_v39 = vld [vmem:[#allocation2 + $0xf8] sm:$0xff] }
 0x300   :  { %974 = vmatpush.msrb.mxu2 %v2131_v18 }
 0x301   :  { %1042 = vmatpush.msra.mxu3 %v2134_v19  ;;  %1062 = vmatpush.msra.mxu0 %v1408_v11  ;;  %v1412_v19 = vld [vmem:[#allocation2 + $0xe0] sm:$0xff] }
 0x302   :  { %975 = vmatpush.msrb.mxu2 %v2138_v36  ;;  %v2426_v11 = vld [vmem:[#allocation34_spill] sm:$0xff] }
 0x303   :  { %1043 = vmatpush.msra.mxu3 %v2141_v21  ;;  %1063 = vmatpush.msra.mxu0 %v1409_v42  ;;  %v1413_v21 = vld [vmem:[#allocation2 + $0xc8] sm:$0xff]  ;;  %v221_v42 = vadd.f32 %v2426_v11, %v1967_v44 }
 0x304   :  { %976 = vmatpush.msrb.mxu2 %v2145_v40 }
 0x305   :  { %1044 = vmatpush.msra.mxu3 %v2148_v22  ;;  %1064 = vmatpush.msra.mxu0 %v1410_v16  ;;  %v1414_v22 = vld [vmem:[#allocation2 + $0xb0] sm:$0xff] }
 0x306   :  { %977 = vmatpush.msrb.mxu2 %v2152_v45 }
 0x307   :  { %1045 = vmatpush.msra.mxu3 %v2155_v23  ;;  %1065 = vmatpush.msra.mxu0 %v1411_v39  ;;  %v1415_v23 = vld [vmem:[#allocation2 + $0x98] sm:$0xff] }
 0x308   :  { %978 = vmatpush.msrb.mxu2 %v2159_v47 }
 0x309   :  { %1046 = vmatpush.msra.mxu3 %v2162_v24  ;;  %1066 = vmatpush.msra.mxu0 %v1412_v19  ;;  %v1416_v24 = vld [vmem:[#allocation2 + $0x80] sm:$0xff] }
 0x30a   :  { %979 = vmatpush.msrb.mxu2 %v2166_v48 }
 0x30b   :  { %1047 = vmatpush.msra.mxu3 %v2169_v25  ;;  %1067 = vmatpush.msra.mxu0 %v1413_v21  ;;  %v1417_v25 = vld [vmem:[#allocation2 + $0x68] sm:$0xff] }
 0x30c   :  { %980 = vmatpush.msrb.mxu2 %v2173_v49 }
 0x30d   :  { %1048 = vmatpush.msra.mxu3 %v2176_v26  ;;  %1068 = vmatpush.msra.mxu0 %v1414_v22  ;;  %v1418_v26 = vld [vmem:[#allocation2 + $0x50] sm:$0xff] }
 0x30e   :  { %981 = vmatpush.msrb.mxu2 %v2180_v51 }
 0x30f   :  { %1049 = vmatpush.msra.mxu3 %v2183_v27  ;;  %1069 = vmatpush.msra.mxu0 %v1415_v23  ;;  %v1419_v27 = vld [vmem:[#allocation2 + $0x38] sm:$0xff] }
 0x310   :  { %982 = vmatpush.msrb.mxu2 %v2187_v52 }
 0x311   :  { %1050 = vmatpush.msra.mxu3 %v2190_v28  ;;  %1070 = vmatpush.msra.mxu0 %v1416_v24  ;;  %v1420_v28 = vld [vmem:[#allocation2 + $0x20] sm:$0xff] }
 0x312   :  { %983 = vmatpush.msrb.mxu2 %v2194_v53 }
 0x313   :  { %1051 = vmatpush.msra.mxu3 %v2197_v30  ;;  %1071 = vmatpush.msra.mxu0 %v1417_v25  ;;  %v1421_v30 = vld [vmem:[#allocation2 + $0x8] sm:$0xff] }
 0x314   :  { %984 = vmatpush.msrb.mxu2 %v2201_v54 }
 0x315   :  { %1052 = vmatpush.msra.mxu3 %v2204_v32  ;;  %1072 = vmatpush.msra.mxu0 %v1418_v26  ;;  %v2424_v32 = vld [vmem:[#allocation33_spill] sm:$0xff] }
 0x316   :  { %985 = vmatpush.msrb.mxu2 %v2208_v56  ;;  %v180_v37 = vadd.f32 %v2424_v32, %v2417_v14 }
 0x317   :  { %1053 = vmatpush.msra.mxu3 %v2211_v35  ;;  %1073 = vmatpush.msra.mxu0 %v1419_v27  ;;  %v2425_v35 = vld [vmem:[#allocation24_spill] sm:$0xff] }
 0x318   :  { %986 = vmatpush.msrb.mxu2 %v2215_v57 }
 0x319   :  { %1054 = vmatpush.msra.mxu3 %v2218_v38  ;;  %1074 = vmatpush.msra.mxu0 %v1420_v28 }
 0x31a   :  { %987 = vmatpush.msrb.mxu2 %v2222_v1 }
 0x31b   :  { %1055 = vmatpush.msra.mxu3 %v2225_v58  ;;  %1075 = vmatpush.msra.mxu0 %v1421_v30 }
 0x379   :  { %v773_v46 = vpop.f32.mrf.mxu0 }
 0x37a   :  { %v816_v20 = vadd.f32 %v1964_v33, %v773_v46 }
 0x37e   :  { %v733_v60 = vpop.f32.mrf.mxu2  ;;  %v753_v55 = vpop.f32.mrf.mxu3 }
 0x37f   :  { %v776_v43 = vadd.f32 %v733_v60, %v2425_v35  ;;  %v796_v3 = vadd.f32 %v753_v55, %v180_v37 }
 0x381   :  { %v1276_v5 = vmul.f32 -1.442695, %v776_v43  ;;  %v1277_v7 = vmul.f32 -1.442695, %v796_v3 }
 0x383   :  { %1334 = vpow2.f32 %v1276_v5 }
 0x384   :  { %1336 = vpow2.f32 %v1277_v7  ;;  %v2307_v7 = vld [vmem:[%s2345_s5] ss:$0 sm:$0xff] }
 0x389   :  { %v1335_v38 = vpop.eup %1334 }
 0x38a   :  { %v1337_v8 = vpop.eup %1336  ;;  %v780_v10 = vadd.f32 1.0, %v1335_v38 }
 0x38b   :  { %v800_v6 = vadd.f32 1.0, %v1337_v8  ;;  %v2429_v8 = vld [vmem:[#allocation36_spill] sm:$0xff] }
 0x38c   :  { %1338 = vrcp.f32 %v780_v10  ;;  %v792_v2 = vand.u32 2147483648, %v780_v10  ;;  %v790_v0 = vand.u32 2147483647, %v780_v10  ;;  %vm786_vm2 = vweird.f32 %v780_v10 }
 0x38d   :  { %1340 = vrcp.f32 %v800_v6  ;;  %v812_v16 = vand.u32 2147483648, %v800_v6  ;;  %vm806_vm6 = vweird.f32 %v800_v6  ;;  %v810_v19 = vand.u32 2147483647, %v800_v6 }
 0x38e   :  { %v793_v13 = vor.u32 1.1754944e-38, %v792_v2  ;;  %vm791_vm4 = vcmp.eq.f32.partialorder %v790_v0, 8.507059e+37 }
 0x38f   :  { %v813_v23 = vor.u32 1.1754944e-38, %v812_v16  ;;  %vm811_vm8 = vcmp.eq.f32.partialorder %v810_v19, 8.507059e+37 }
 0x392   :  { %v1339_v58 = vpop.eup %1338 }
 0x393   :  { %v1341_v50 = vpop.eup %1340  ;;  %v782_v63 = vmul.f32 %v1339_v58, %v780_v10  ;;  %vm787_vm1 = vweird.f32 %v1339_v58  ;;  %v224_v10 = vadd.f32 %v2429_v8, %v1967_v44  ;;  %v1164_v8 = vld [vmem:[#allocation5 + $0x78] sm:$0xff] }
 0x394   :  { %v802_v41 = vmul.f32 %v1341_v50, %v800_v6  ;;  %vm788_vm3 = vmor %vm786_vm2, %vm787_vm1  ;;  %vm807_vm5 = vweird.f32 %v1341_v50 }
 0x395   :  { %v783_v29 = vsub.f32 1.0, %v782_v63  ;;  %vm808_vm7 = vmor %vm806_vm6, %vm807_vm5 }
 0x396   :  { %v803_v61 = vsub.f32 1.0, %v802_v41 }
 0x397   :  { %v784_v9 = vmul.f32 %v1339_v58, %v783_v29 }
 0x398   :  { %v804_v12 = vmul.f32 %v1341_v50, %v803_v61 }
 0x399   :  { %v785_v4 = vadd.f32 %v1339_v58, %v784_v9 }
 0x39a   :  { %v805_v62 = vadd.f32 %v1341_v50, %v804_v12 }
 0x39b   :  { %v789_v59 = vsel %vm788_vm3, %v1339_v58, %v785_v4 }
 0x39c   :  { %v794_v34 = vsel %vm791_vm4, %v793_v13, %v789_v59  ;;  %v809_v22 = vsel %vm808_vm7, %v1341_v50, %v805_v62  ;;  %v2430_v59 = vld [vmem:[#allocation37_spill] sm:$0xff] }
 0x39d   :  { %v817_v39 = vmul.f32 %v816_v20, %v794_v34  ;;  %v814_v24 = vsel %vm811_vm8, %v813_v23, %v809_v22  ;;  %v186_v34 = vadd.f32 %v2430_v59, %v2417_v14 }
 0x39e   :  { %v820_v33 = vsub.f32 1.0, %v814_v24  ;;  %v822_v27 = vmul.f32 %v814_v24, %v2236_v31 }
 0x39f   :  { %v818_v21 = vadd.f32 %v817_v39, %v221_v42  ;;  %v2431_v42 = vld [vmem:[#allocation26_spill] sm:$0xff] }
 0x3a1   :  { %1342 = vtanh.f32 %v818_v21 }
 0x3a7   :  { %v1343_v25 = vpop.eup %1342 }
 0x3a8   :  { %v821_v26 = vmul.f32 %v1343_v25, %v820_v33 }
 0x3aa   :  { %v2280_v28 = vadd.f32 %v822_v27, %v821_v26 }
 0x3ac   :  { %840 = vmatmul.f32.vlgmr.msra.gmra.mxu1 %v2280_v28  ;;  %860 = vmatmul.f32.vlgmr.msra.gmra.mxu2 %v2280_v28 }
 0x3ad   :  { %880 = vmatmul.f32.vlgmr.msrb.gmra.mxu3 %v2280_v28  ;;  %1080 = vmatpush.msra.mxu1 %v2117_v15 }
 0x3ae   :  { %1185 = vmatpush.msra.mxu2 %v1164_v8 }
 0x3af   :  { %1081 = vmatpush.msra.mxu1 %v2124_v17  ;;  %v2427_v17 = vld [vmem:[#allocation25_spill] sm:$0xff] }
 0x3b1   :  { %1082 = vmatpush.msra.mxu1 %v2131_v18 }
 0x3b3   :  { %1083 = vmatpush.msra.mxu1 %v2138_v36 }
 0x3b5   :  { %1084 = vmatpush.msra.mxu1 %v2145_v40  ;;  %v2428_v40 = vld [vmem:[#allocation35_spill] sm:$0xff] }
 0x3b7   :  { %1085 = vmatpush.msra.mxu1 %v2152_v45  ;;  %v183_v45 = vadd.f32 %v2428_v40, %v2417_v14 }
 0x3b9   :  { %1086 = vmatpush.msra.mxu1 %v2159_v47 }
 0x3bb   :  { %1087 = vmatpush.msra.mxu1 %v2166_v48 }
 0x3bd   :  { %1088 = vmatpush.msra.mxu1 %v2173_v49 }
 0x3bf   :  { %1089 = vmatpush.msra.mxu1 %v2180_v51 }
 0x3c1   :  { %1090 = vmatpush.msra.mxu1 %v2187_v52 }
 0x3c3   :  { %1091 = vmatpush.msra.mxu1 %v2194_v53 }
 0x3c5   :  { %1092 = vmatpush.msra.mxu1 %v2201_v54 }
 0x3c7   :  { %1093 = vmatpush.msra.mxu1 %v2208_v56 }
 0x3c9   :  { %1094 = vmatpush.msra.mxu1 %v2215_v57 }
 0x3cb   :  { %1095 = vmatpush.msra.mxu1 %v2222_v1 }
 0x429   :  { %v841_v15 = vpop.f32.mrf.mxu1 }
 0x42a   :  { %v884_v18 = vadd.f32 %v841_v15, %v2427_v17 }
 0x42c   :  { %v1278_v36 = vmul.f32 -1.442695, %v884_v18 }
 0x42e   :  { %1344 = vpow2.f32 %v1278_v36 }
 0x42f   :  { %v861_v47 = vpop.f32.mrf.mxu2 }
 0x430   :  { %v904_v48 = vadd.f32 %v861_v47, %v183_v45  ;;  %v881_v60 = vpop.f32.mrf.mxu3 }
 0x431   :  { %v924_v38 = vadd.f32 %v2307_v7, %v881_v60 }
 0x432   :  { %v1279_v49 = vmul.f32 -1.442695, %v904_v48 }
 0x434   :  { %v1345_v51 = vpop.eup %1344  ;;  %1346 = vpow2.f32 %v1279_v49 }
 0x435   :  { %v888_v52 = vadd.f32 1.0, %v1345_v51 }
 0x437   :  { %1348 = vrcp.f32 %v888_v52  ;;  %v900_v31 = vand.u32 2147483648, %v888_v52  ;;  %v898_v32 = vand.u32 2147483647, %v888_v52  ;;  %vm894_vm10 = vweird.f32 %v888_v52 }
 0x439   :  { %v901_v43 = vor.u32 1.1754944e-38, %v900_v31  ;;  %vm899_vm12 = vcmp.eq.f32.partialorder %v898_v32, 8.507059e+37 }
 0x43a   :  { %v1347_v53 = vpop.eup %1346 }
 0x43b   :  { %v908_v54 = vadd.f32 1.0, %v1347_v53 }
 0x43d   :  { %v1349_v56 = vpop.eup %1348  ;;  %1350 = vrcp.f32 %v908_v54  ;;  %v920_v63 = vand.u32 2147483648, %v908_v54  ;;  %v918_v41 = vand.u32 2147483647, %v908_v54  ;;  %vm914_vm14 = vweird.f32 %v908_v54 }
 0x43e   :  { %v890_v57 = vmul.f32 %v1349_v56, %v888_v52  ;;  %vm895_vm9 = vweird.f32 %v1349_v56 }
 0x43f   :  { %vm896_vm11 = vmor %vm894_vm10, %vm895_vm9  ;;  %v921_v9 = vor.u32 1.1754944e-38, %v920_v63  ;;  %vm919_vm0 = vcmp.eq.f32.partialorder %v918_v41, 8.507059e+37  ;;  %v1161_v63 = vld [vmem:[#allocation5 + $0x60] sm:$0xff]  ;;  %v1178_v41 = vld [vmem:[#allocation5 + $0xe8] sm:$0xff] }
 0x440   :  { %v891_v1 = vsub.f32 1.0, %v890_v57 }
 0x442   :  { %v892_v30 = vmul.f32 %v1349_v56, %v891_v1 }
 0x443   :  { %v1351_v37 = vpop.eup %1350 }
 0x444   :  { %v910_v55 = vmul.f32 %v1351_v37, %v908_v54  ;;  %v893_v35 = vadd.f32 %v1349_v56, %v892_v30  ;;  %vm915_vm13 = vweird.f32 %v1351_v37 }
 0x445   :  { %vm916_vm15 = vmor %vm914_vm14, %vm915_vm13 }
 0x446   :  { %v911_v3 = vsub.f32 1.0, %v910_v55  ;;  %v897_v5 = vsel %vm896_vm11, %v1349_v56, %v893_v35  ;;  %v2432_v56 = vld [vmem:[#allocation38_spill] sm:$0xff] }
 0x447   :  { %v902_v6 = vsel %vm899_vm12, %v901_v43, %v897_v5  ;;  %v227_v57 = vadd.f32 %v2432_v56, %v1967_v44 }
 0x448   :  { %v912_v58 = vmul.f32 %v1351_v37, %v911_v3  ;;  %v925_v50 = vmul.f32 %v924_v38, %v902_v6  ;;  %v1180_v6 = vld [vmem:[#allocation5 + $0xf8] sm:$0xff] }
 0x449   :  { %1205 = vmatpush.msrb.mxu3 %v1180_v6  ;;  %v2435_v6 = vld [vmem:[#allocation40_spill] sm:$0xff] }
 0x44a   :  { %v926_v29 = vadd.f32 %v925_v50, %v224_v10  ;;  %v913_v2 = vadd.f32 %v1351_v37, %v912_v58  ;;  %v1163_v10 = vld [vmem:[#allocation5 + $0x70] sm:$0xff]  ;;  %v1162_v58 = vld [vmem:[#allocation5 + $0x68] sm:$0xff] }
 0x44b   :  { %1186 = vmatpush.msra.mxu2 %v1163_v10  ;;  %v1179_v50 = vld [vmem:[#allocation5 + $0xf0] sm:$0xff] }
 0x44c   :  { %1352 = vtanh.f32 %v926_v29  ;;  %v917_v61 = vsel %vm916_vm15, %v1351_v37, %v913_v2  ;;  %1206 = vmatpush.msrb.mxu3 %v1179_v50  ;;  %v1160_v29 = vld [vmem:[#allocation5 + $0x58] sm:$0xff]  ;;  %v1177_v2 = vld [vmem:[#allocation5 + $0xe0] sm:$0xff] }
 0x44d   :  { %v922_v0 = vsel %vm919_vm0, %v921_v9, %v917_v61  ;;  %1187 = vmatpush.msra.mxu2 %v1162_v58  ;;  %v2433_v61 = vld [vmem:[#allocation39_spill] sm:$0xff]  ;;  %v230_v58 = vadd.f32 %v2435_v6, %v1967_v44  ;;  %v1293_v44 = vld [vmem:[%s2347_s7] ss:$0 sm:$0xff] }
 0x44e   :  { %v928_v46 = vsub.f32 1.0, %v922_v0  ;;  %v930_v13 = vmul.f32 %v922_v0, %v2280_v28  ;;  %1207 = vmatpush.msrb.mxu3 %v1178_v41  ;;  %v189_v9 = vadd.f32 %v2433_v61, %v2417_v14  ;;  %v1159_v0 = vld [vmem:[#allocation5 + $0x50] sm:$0xff]  ;;  %v1172_v14 = vld [vmem:[#allocation5 + $0xb8] sm:$0xff] }
 0x44f   :  { %1188 = vmatpush.msra.mxu2 %v1161_v63 }
 0x450   :  { %1208 = vmatpush.msrb.mxu3 %v1177_v2 }
 0x451   :  { %1189 = vmatpush.msra.mxu2 %v1160_v29 }
 0x452   :  { %v1353_v12 = vpop.eup %1352 }
 0x453   :  { %v929_v4 = vmul.f32 %v1353_v12, %v928_v46  ;;  %v1176_v46 = vld [vmem:[#allocation5 + $0xd8] sm:$0xff]  ;;  %1190 = vmatpush.msra.mxu2 %v1159_v0 }
 0x454   :  { %1209 = vmatpush.msrb.mxu3 %v1176_v46 }
 0x455   :  { %v931_v20 = vadd.f32 %v930_v13, %v929_v4  ;;  %v1158_v13 = vld [vmem:[#allocation5 + $0x48] sm:$0xff] }
 0x456   :  { %1191 = vmatpush.msra.mxu2 %v1158_v13 }
 0x457   :  { %948 = vmatmul.f32.vlgmr.msrb.gmra.mxu0 %v931_v20  ;;  %968 = vmatmul.f32.vlgmr.msrb.gmra.mxu1 %v931_v20 }
 0x458   :  { %988 = vmatmul.f32.vlgmr.msrb.gmra.mxu2 %v931_v20 }
 0x4d4   :  { %v949_v62 = vpop.f32.mrf.mxu0  ;;  %v969_v11 = vpop.f32.mrf.mxu1 }
 0x4d5   :  { %v992_v16 = vadd.f32 %v949_v62, %v2431_v42  ;;  %v1012_v39 = vadd.f32 %v969_v11, %v186_v34  ;;  %v1157_v34 = vld [vmem:[#allocation5 + $0x40] sm:$0xff]  ;;  %v1174_v62 = vld [vmem:[#allocation5 + $0xc8] sm:$0xff]  ;;  %v1156_v11 = vld [vmem:[#allocation5 + $0x38] sm:$0xff] }
 0x4d6   :  { %1192 = vmatpush.msra.mxu2 %v1157_v34  ;;  %v1173_v42 = vld [vmem:[#allocation5 + $0xc0] sm:$0xff] }
 0x4d7   :  { %v1280_v19 = vmul.f32 -1.442695, %v992_v16  ;;  %v1281_v21 = vmul.f32 -1.442695, %v1012_v39  ;;  %v1155_v16 = vld [vmem:[#allocation5 + $0x30] sm:$0xff] }
 0x4d8   :  { %1193 = vmatpush.msra.mxu2 %v1156_v11 }
 0x4d9   :  { %1354 = vpow2.f32 %v1280_v19  ;;  %v2434_v19 = vld [vmem:[#allocation27_spill] sm:$0xff] }
 0x4da   :  { %1356 = vpow2.f32 %v1281_v21  ;;  %1194 = vmatpush.msra.mxu2 %v1155_v16 }
 0x4db   :  { %v989_v47 = vpop.f32.mrf.mxu2 }
 0x4dc   :  { %v1032_v52 = vadd.f32 %v2307_v7, %v989_v47  ;;  %v1149_v47 = vld [vmem:[#allocation5] sm:$0xff] }
 0x4df   :  { %v1355_v22 = vpop.eup %1354 }
 0x4e0   :  { %v1357_v23 = vpop.eup %1356  ;;  %v996_v24 = vadd.f32 1.0, %v1355_v22  ;;  %v1154_v22 = vld [vmem:[#allocation5 + $0x28] sm:$0xff] }
 0x4e1   :  { %v1016_v33 = vadd.f32 1.0, %v1357_v23  ;;  %v1171_v23 = vld [vmem:[#allocation5 + $0xb0] sm:$0xff]  ;;  %1195 = vmatpush.msra.mxu2 %v1154_v22 }
 0x4e2   :  { %1358 = vrcp.f32 %v996_v24  ;;  %v1008_v18 = vand.u32 2147483648, %v996_v24  ;;  %v1006_v40 = vand.u32 2147483647, %v996_v24  ;;  %vm1002_vm2 = vweird.f32 %v996_v24 }
 0x4e3   :  { %1360 = vrcp.f32 %v1016_v33  ;;  %v1028_v31 = vand.u32 2147483648, %v1016_v33  ;;  %vm1022_vm6 = vweird.f32 %v1016_v33  ;;  %v1026_v30 = vand.u32 2147483647, %v1016_v33 }
 0x4e4   :  { %v1009_v49 = vor.u32 1.1754944e-38, %v1008_v18  ;;  %vm1007_vm4 = vcmp.eq.f32.partialorder %v1006_v40, 8.507059e+37  ;;  %v1168_v18 = vld [vmem:[#allocation5 + $0x98] sm:$0xff]  ;;  %v1167_v40 = vld [vmem:[#allocation5 + $0x90] sm:$0xff] }
 0x4e5   :  { %v1029_v60 = vor.u32 1.1754944e-38, %v1028_v31  ;;  %vm1027_vm8 = vcmp.eq.f32.partialorder %v1026_v30, 8.507059e+37 }
 0x4e8   :  { %v1359_v25 = vpop.eup %1358 }
 0x4e9   :  { %v1361_v26 = vpop.eup %1360  ;;  %v998_v27 = vmul.f32 %v1359_v25, %v996_v24  ;;  %vm1003_vm1 = vweird.f32 %v1359_v25 }
 0x4ea   :  { %v1018_v28 = vmul.f32 %v1361_v26, %v1016_v33  ;;  %vm1004_vm3 = vmor %vm1002_vm2, %vm1003_vm1  ;;  %vm1023_vm5 = vweird.f32 %v1361_v26  ;;  %v1153_v33 = vld [vmem:[#allocation5 + $0x20] sm:$0xff] }
 0x4eb   :  { %v999_v15 = vsub.f32 1.0, %v998_v27  ;;  %vm1024_vm7 = vmor %vm1022_vm6, %vm1023_vm5  ;;  %v1152_v27 = vld [vmem:[#allocation5 + $0x18] sm:$0xff]  ;;  %1196 = vmatpush.msra.mxu2 %v1153_v33 }
 0x4ec   :  { %v1019_v17 = vsub.f32 1.0, %v1018_v28  ;;  %v1169_v28 = vld [vmem:[#allocation5 + $0xa0] sm:$0xff] }
 0x4ed   :  { %v1000_v36 = vmul.f32 %v1359_v25, %v999_v15  ;;  %1197 = vmatpush.msra.mxu2 %v1152_v27 }
 0x4ee   :  { %v1020_v45 = vmul.f32 %v1361_v26, %v1019_v17  ;;  %v1151_v17 = vld [vmem:[#allocation5 + $0x10] sm:$0xff] }
 0x4ef   :  { %v1001_v48 = vadd.f32 %v1359_v25, %v1000_v36  ;;  %v1150_v36 = vld [vmem:[#allocation5 + $0x8] sm:$0xff]  ;;  %1198 = vmatpush.msra.mxu2 %v1151_v17 }
 0x4f0   :  { %v1021_v54 = vadd.f32 %v1361_v26, %v1020_v45 }
 0x4f1   :  { %v1005_v51 = vsel %vm1004_vm3, %v1359_v25, %v1001_v48  ;;  %v1170_v25 = vld [vmem:[#allocation5 + $0xa8] sm:$0xff]  ;;  %1199 = vmatpush.msra.mxu2 %v1150_v36 }
 0x4f2   :  { %v1010_v53 = vsel %vm1007_vm4, %v1009_v49, %v1005_v51  ;;  %v1025_v37 = vsel %vm1024_vm7, %v1361_v26, %v1021_v54  ;;  %v1166_v48 = vld [vmem:[#allocation5 + $0x88] sm:$0xff]  ;;  %v1165_v51 = vld [vmem:[#allocation5 + $0x80] sm:$0xff] }
 0x4f3   :  { %v1033_v1 = vmul.f32 %v1032_v52, %v1010_v53  ;;  %v1030_v55 = vsel %vm1027_vm8, %v1029_v60, %v1025_v37  ;;  %1200 = vmatpush.msra.mxu2 %v1149_v47  ;;  %v1148_v52 = vld [vmem:[%s2341_s1] sm:$0xff] }
 0x4f4   :  { %v1036_v35 = vsub.f32 1.0, %v1030_v55  ;;  %v1038_v5 = vmul.f32 %v1030_v55, %v931_v20  ;;  %v1175_v20 = vld [vmem:[#allocation5 + $0xd0] sm:$0xff] }
 0x4f5   :  { %v1034_v32 = vadd.f32 %v1033_v1, %v227_v57  ;;  %1210 = vmatpush.msrb.mxu3 %v1175_v20 }
 0x4f7   :  { %1362 = vtanh.f32 %v1034_v32  ;;  %1211 = vmatpush.msrb.mxu3 %v1174_v62 }
 0x4f9   :  { %1212 = vmatpush.msrb.mxu3 %v1173_v42 }
 0x4fb   :  { %1213 = vmatpush.msrb.mxu3 %v1172_v14 }
 0x4fd   :  { %v1363_v43 = vpop.eup %1362  ;;  %1214 = vmatpush.msrb.mxu3 %v1171_v23 }
 0x4fe   :  { %v1037_v3 = vmul.f32 %v1363_v43, %v1036_v35 }
 0x4ff   :  { %1215 = vmatpush.msrb.mxu3 %v1170_v25 }
 0x500   :  { %v2319_v38 = vadd.f32 %v1038_v5, %v1037_v3 }
 0x501   :  { %1216 = vmatpush.msrb.mxu3 %v1169_v28 }
 0x502   :  { %1056 = vmatmul.f32.vlgmr.msra.gmra.mxu3 %v2319_v38  ;;  %1076 = vmatmul.f32.vlgmr.msra.gmra.mxu0 %v2319_v38 }
 0x503   :  { %1096 = vmatmul.f32.vlgmr.msra.gmra.mxu1 %v2319_v38  ;;  %1217 = vmatpush.msrb.mxu3 %v1168_v18 }
 0x505   :  { %1218 = vmatpush.msrb.mxu3 %v1167_v40 }
 0x507   :  { %1219 = vmatpush.msrb.mxu3 %v1166_v48 }
 0x509   :  { %1220 = vmatpush.msrb.mxu3 %v1165_v51 }
 0x50a   :  { %1221 = vmatmul.f32.vlgmr.msrb.gmra.mxu3 %v1148_v52 }
 0x57f   :  { %v1077_v12 = vpop.f32.mrf.mxu0 }
 0x580   :  { %v1120_v4 = vadd.f32 %v1077_v12, %v189_v9  ;;  %v1097_v55 = vpop.f32.mrf.mxu1 }
 0x581   :  { %v1140_v3 = vadd.f32 %v2307_v7, %v1097_v55 }
 0x582   :  { %v1283_v59 = vmul.f32 -1.442695, %v1120_v4 }
 0x584   :  { %1364 = vpow2.f32 %v1283_v59 }
 0x585   :  { %v1057_v39 = vpop.f32.mrf.mxu3 }
 0x586   :  { %v1100_v21 = vadd.f32 %v1057_v39, %v2434_v19 }
 0x588   :  { %v1282_v24 = vmul.f32 -1.442695, %v1100_v21 }
 0x58a   :  { %v1365_v26 = vpop.eup %1364  ;;  %1366 = vpow2.f32 %v1282_v24 }
 0x58b   :  { %v1124_v15 = vadd.f32 1.0, %v1365_v26 }
 0x58d   :  { %1368 = vrcp.f32 %v1124_v15  ;;  %v1136_v50 = vand.u32 2147483648, %v1124_v15  ;;  %vm1130_vm14 = vweird.f32 %v1124_v15  ;;  %v1134_v41 = vand.u32 2147483647, %v1124_v15  ;;  %v1222_v20 = vpop.f32.mrf.mxu3 }
 0x58f   :  { %v1137_v61 = vor.u32 1.1754944e-38, %v1136_v50  ;;  %vm1135_vm0 = vcmp.eq.f32.partialorder %v1134_v41, 8.507059e+37 }
 0x590   :  { %v1367_v45 = vpop.eup %1366 }
 0x591   :  { %v1104_v49 = vadd.f32 1.0, %v1367_v45 }
 0x593   :  { %1370 = vrcp.f32 %v1104_v49  ;;  %v1369_v53 = vpop.eup %1368  ;;  %v1116_v30 = vand.u32 2147483648, %v1104_v49  ;;  %v1114_v37 = vand.u32 2147483647, %v1104_v49  ;;  %vm1110_vm10 = vweird.f32 %v1104_v49 }
 0x594   :  { %v1126_v54 = vmul.f32 %v1369_v53, %v1124_v15  ;;  %vm1131_vm13 = vweird.f32 %v1369_v53 }
 0x595   :  { %v1117_v43 = vor.u32 1.1754944e-38, %v1116_v30  ;;  %vm1115_vm12 = vcmp.eq.f32.partialorder %v1114_v37, 8.507059e+37  ;;  %vm1132_vm15 = vmor %vm1130_vm14, %vm1131_vm13 }
 0x596   :  { %v1127_v1 = vsub.f32 1.0, %v1126_v54 }
 0x598   :  { %v1128_v60 = vmul.f32 %v1369_v53, %v1127_v1 }
 0x599   :  { %v1371_v56 = vpop.eup %1370 }
 0x59a   :  { %v1106_v57 = vmul.f32 %v1371_v56, %v1104_v49  ;;  %vm1111_vm9 = vweird.f32 %v1371_v56  ;;  %v1129_v10 = vadd.f32 %v1369_v53, %v1128_v60 }
 0x59b   :  { %vm1112_vm11 = vmor %vm1110_vm10, %vm1111_vm9 }
 0x59c   :  { %v1107_v31 = vsub.f32 1.0, %v1106_v57  ;;  %v1133_v2 = vsel %vm1132_vm15, %v1369_v53, %v1129_v10 }
 0x59d   :  { %v1138_v9 = vsel %vm1135_vm0, %v1137_v61, %v1133_v2 }
 0x59e   :  { %v1108_v32 = vmul.f32 %v1371_v56, %v1107_v31  ;;  %v1144_v7 = vsub.f32 1.0, %v1138_v9  ;;  %v1146_v12 = vmul.f32 %v1138_v9, %v2319_v38 }
 0x5a0   :  { %v1109_v35 = vadd.f32 %v1371_v56, %v1108_v32 }
 0x5a2   :  { %v1113_v5 = vsel %vm1112_vm11, %v1371_v56, %v1109_v35 }
 0x5a3   :  { %v1118_v8 = vsel %vm1115_vm12, %v1117_v43, %v1113_v5 }
 0x5a4   :  { %v1141_v63 = vmul.f32 %v1140_v3, %v1118_v8 }
 0x5a6   :  { %v1142_v29 = vadd.f32 %v1141_v63, %v230_v58 }
 0x5a8   :  { %1372 = vtanh.f32 %v1142_v29 }
 0x5ae   :  { %v1373_v0 = vpop.eup %1372 }
 0x5af   :  { %v1145_v46 = vmul.f32 %v1373_v0, %v1144_v7 }
 0x5b1   :  { %v1147_v4 = vadd.f32 %v1146_v12, %v1145_v46 }
 0x5b3   :  { %1201 = vmatmul.f32.vlgmr.msra.gmra.mxu2 %v1147_v4 }
 0x636   :  { %v1202_v13 = vpop.f32.mrf.mxu2 }
 0x637   :  { %v1203_v59 = vadd.f32 %v1293_v44, %v1202_v13 }
 0x639   :  { %v1223_v34 = vadd.f32 %v1222_v20, %v1203_v59 }
 0x63b   :  { %1225 = vst [vmem:[#allocation7] sm:$0xff] %v1223_v34 }
 0x63c   :  { %1236 = dma.vmem_to_hbm [thread:$0]  %s1232_s27, 128, %s1234_s30, [#allocation4]  }
 0x63d   :  { %1499 = dma.done.wait [#allocation4], 128  }
 0x63e   :  { %1500 = vsyncadd [#allocation4], 4294967168 }
 0x63f   :  { %1241 = vsyncpa [#allocation3], 1 }
 0x640   :  { %1242 = vsyncpa [#allocation6], 1 }
 0x641   :  { %1243 = vsyncpa [#allocation4], 1 }

</bundles_post_ra>
